<compile_context>
chip_gen: v7x
topology: tpu7x:2x2x1
jax: 0.10.0
libtpu: 0.0.40
codegen_flags: <defaults>
</compile_context>

<pallas_src>
import functools

import jax
import jax.numpy as jnp
from jax.experimental import pallas as pl
from jax.experimental.pallas import tpu as pltpu

D_NONPROJ = 768            # BatchNorm1d(768) / Adapter(768) / Linear(768, C)
D_PROJ = 512               # BatchNorm1d(512) / Linear(512, C)
ADAPTER_HID = 768 // 4     # 192, standard CLIP-Adapter reduction=4 (bias-free)
ADAPTER_HID_PAD = 256      # MXU/lane aligned (zero-padded, exact)
RATIO = 0.2                # self.ratio
BN_EPS = 1e-5

_LANE = 128
_SUBLANE = 8
# 2048-wide class tiles fit the v5e 16 MiB default scoped VMEM (double-buffered
# bf16 weight tiles ~10 MiB total); bump to 4096 on v6e/v7x for fewer steps.
_TN_TARGET = 2048


def _round_up(x, m):
    return (x + m - 1) // m * m


def _choose_class_tile(c128, target=_TN_TARGET):
    """Near-equal 128-multiple class tiles (avoids up-to-TN padding waste)."""
    if c128 <= target:
        return c128
    n_tiles = -(-c128 // target)                     # ceil
    return _round_up(-(-c128 // n_tiles), _LANE)


# --------------------------------------------------------------------------
# Kernel 1: batch-only work (Adapter MLP, residual mix, both BatchNorms,
# eval-mode concat).  Single grid step; b_ref is the scalar-prefetch batch
# count living in SMEM.
# --------------------------------------------------------------------------
def _batch_head_kernel(b_ref, xnp_ref, xp_ref, wd_ref, wu_ref,
                       g1_ref, b1_ref, g2_ref, b2_ref,
                       y1_ref, y2_ref, cat_ref):
    xnp = xnp_ref[...]                               # [Bp, 768] f32 (zero-padded rows)
    xp = xp_ref[...]                                 # [Bp, 512] f32

    # Adapter(768): Linear -> ReLU -> Linear -> ReLU (bias-free, bf16 weights)
    h = jnp.maximum(
        jnp.dot(xnp.astype(jnp.bfloat16), wd_ref[...],
                preferred_element_type=jnp.float32), 0.0)
    a = jnp.maximum(
        jnp.dot(h.astype(jnp.bfloat16), wu_ref[...],
                preferred_element_type=jnp.float32), 0.0)

    # image_features_non_proj = ratio * adapter(x) + (1 - ratio) * x
    mixed = RATIO * a + (1.0 - RATIO) * xnp

    # Training-mode BatchNorm1d over the real batch rows only
    # (padded rows are zero and excluded from the statistics).
    b = b_ref[0]
    b_pad = xnp.shape[0]
    row = jax.lax.broadcasted_iota(jnp.int32, (b_pad, 1), 0)
    valid = (row < b).astype(jnp.float32)
    inv_b = 1.0 / b.astype(jnp.float32)

    m1 = jnp.sum(mixed * valid, axis=0, keepdims=True) * inv_b
    d1 = (mixed - m1) * valid
    v1 = jnp.sum(d1 * d1, axis=0, keepdims=True) * inv_b
    y1 = g1_ref[...] * (mixed - m1) * jax.lax.rsqrt(v1 + BN_EPS) + b1_ref[...]

    m2 = jnp.sum(xp * valid, axis=0, keepdims=True) * inv_b
    d2 = (xp - m2) * valid
    v2 = jnp.sum(d2 * d2, axis=0, keepdims=True) * inv_b
    y2 = g2_ref[...] * (xp - m2) * jax.lax.rsqrt(v2 + BN_EPS) + b2_ref[...]

    y1_ref[...] = y1.astype(jnp.bfloat16)
    y2_ref[...] = y2.astype(jnp.bfloat16)

    # eval branch: torch.cat((image_features_non_proj, image_features), 1)
    cat_ref[:, :D_NONPROJ] = mixed
    cat_ref[:, D_NONPROJ:] = xp


# --------------------------------------------------------------------------
# Kernel 2: bias-free classifiers, streamed over lane-dense class tiles.
# No cross-step state -> class axis is 'parallel'.
# --------------------------------------------------------------------------
def _classifier_kernel(y1_ref, y2_ref, wc_ref, wcp_ref, cls_ref, clsp_ref):
    cls_ref[...] = jnp.dot(y1_ref[...], wc_ref[...],
                           preferred_element_type=jnp.float32)
    clsp_ref[...] = jnp.dot(y2_ref[...], wcp_ref[...],
                            preferred_element_type=jnp.float32)


def prepare_params(params):
    """One-time weight prep (pad + bf16 cast) hoisted out of the forward path."""
    C = params["w_cls"].shape[1]
    C_128 = max(_round_up(C, _LANE), _LANE)
    TN = _choose_class_tile(C_128)
    C_pad = _round_up(C_128, TN)

    bf16, f32 = jnp.bfloat16, jnp.float32
    prep = {
        "wd": jnp.pad(params["w_down"],
                      ((0, 0), (0, ADAPTER_HID_PAD - ADAPTER_HID))).astype(bf16),
        "wu": jnp.pad(params["w_up"],
                      ((0, ADAPTER_HID_PAD - ADAPTER_HID), (0, 0))).astype(bf16),
        "wc": jnp.pad(params["w_cls"], ((0, 0), (0, C_pad - C))).astype(bf16),
        "wcp": jnp.pad(params["w_cls_proj"], ((0, 0), (0, C_pad - C))).astype(bf16),
        "g1": params["bn1_g"].reshape(1, D_NONPROJ).astype(f32),
        "b1": params["bn1_b"].reshape(1, D_NONPROJ).astype(f32),
        "g2": params["bn2_g"].reshape(1, D_PROJ).astype(f32),
        "b2": params["bn2_b"].reshape(1, D_PROJ).astype(f32),
    }
    static_cfg = {"num_classes": C, "tn": TN}
    return prep, static_cfg


def clip_adapter_head(xnp_cls, xp_cls, prep, *, num_classes, tn, b_actual=None):
    """xnp_cls: [B, 768], xp_cls: [B, 512] CLS-token features (float32).

    Returns (cls_score [B, C], cls_score_proj [B, C], eval_concat [B, 1280]).
    """
    B = xnp_cls.shape[0]
    if b_actual is None:
        b_actual = B
    b_arr = jnp.asarray(b_actual, jnp.int32).reshape((1,))

    f32, bf16 = jnp.float32, jnp.bfloat16
    B_pad = max(_round_up(B, _SUBLANE), _SUBLANE)
    C_pad = prep["wc"].shape[1]
    n_tiles = C_pad // tn

    def pad_rows(x):
        return jnp.pad(x.astype(f32), ((0, B_pad - B), (0, 0)))

    xnp = pad_rows(xnp_cls)
    xp = pad_rows(xp_cls)

    # ---- Kernel 1: adapter + BN + eval concat (single grid step) -----------
    def cmap(i, b):                                  # scalar-prefetch ref is trailing
        return (0, 0)

    y1, y2, eval_cat = pl.pallas_call(
        _batch_head_kernel,
        out_shape=(
            jax.ShapeDtypeStruct((B_pad, D_NONPROJ), bf16),
            jax.ShapeDtypeStruct((B_pad, D_PROJ), bf16),
            jax.ShapeDtypeStruct((B_pad, D_NONPROJ + D_PROJ), f32),
        ),
        grid_spec=pltpu.PrefetchScalarGridSpec(
            num_scalar_prefetch=1,
            grid=(1,),
            in_specs=[
                pl.BlockSpec((B_pad, D_NONPROJ), cmap),          # xnp (CLS, 768)
                pl.BlockSpec((B_pad, D_PROJ), cmap),              # xp  (CLS, 512)
                pl.BlockSpec((D_NONPROJ, ADAPTER_HID_PAD), cmap),  # adapter down
                pl.BlockSpec((ADAPTER_HID_PAD, D_NONPROJ), cmap),  # adapter up
                pl.BlockSpec((1, D_NONPROJ), cmap),                # BN1 gamma
                pl.BlockSpec((1, D_NONPROJ), cmap),                # BN1 beta
                pl.BlockSpec((1, D_PROJ), cmap),                   # BN2 gamma
                pl.BlockSpec((1, D_PROJ), cmap),                   # BN2 beta
            ],
            out_specs=(
                pl.BlockSpec((B_pad, D_NONPROJ), cmap),            # BN1 out (bf16)
                pl.BlockSpec((B_pad, D_PROJ), cmap),               # BN2 out (bf16)
                pl.BlockSpec((B_pad, D_NONPROJ + D_PROJ), cmap),   # eval concat
            ),
        ),
        compiler_params=pltpu.CompilerParams(
            dimension_semantics=("arbitrary",)),
    )(b_arr, xnp, xp, prep["wd"], prep["wu"],
      prep["g1"], prep["b1"], prep["g2"], prep["b2"])

    # ---- Kernel 2: class-tiled classifier weight streaming -----------------
    flops = 2 * B_pad * (D_NONPROJ + D_PROJ) * C_pad
    bytes_accessed = ((prep["wc"].size + prep["wcp"].size) * 2
                      + (y1.size + y2.size) * 2
                      + 2 * B_pad * C_pad * 4)

    cls_score, cls_score_proj = pl.pallas_call(
        _classifier_kernel,
        out_shape=(
            jax.ShapeDtypeStruct((B_pad, C_pad), f32),
            jax.ShapeDtypeStruct((B_pad, C_pad), f32),
        ),
        grid_spec=pltpu.PrefetchScalarGridSpec(
            num_scalar_prefetch=0,
            grid=(n_tiles,),
            in_specs=[
                pl.BlockSpec((B_pad, D_NONPROJ), lambda j: (0, 0)),  # BN1 out
                pl.BlockSpec((B_pad, D_PROJ), lambda j: (0, 0)),     # BN2 out
                pl.BlockSpec((D_NONPROJ, tn), lambda j: (0, j)),     # w_cls tile
                pl.BlockSpec((D_PROJ, tn), lambda j: (0, j)),        # w_cls_proj tile
            ],
            out_specs=(
                pl.BlockSpec((B_pad, tn), lambda j: (0, j)),         # cls_score
                pl.BlockSpec((B_pad, tn), lambda j: (0, j)),         # cls_score_proj
            ),
        ),
        compiler_params=pltpu.CompilerParams(
            # Tiles are independent -> shard across TensorCores on v7x.
            dimension_semantics=("parallel",)),
        cost_estimate=pl.CostEstimate(
            flops=flops, transcendentals=0, bytes_accessed=bytes_accessed),
    )(y1, y2, prep["wc"], prep["wcp"])

    return (cls_score[:B, :num_classes],
            cls_score_proj[:B, :num_classes],
            eval_cat[:B])


def init_params(key, num_classes):
    # weights_init_classifier: normal(std=0.001), bias-free Linears;
    # weights_init_kaiming: BN gamma=1, beta=0.
    k1, k2, k3, k4 = jax.random.split(key, 4)
    std = 0.001
    return {
        "w_down": std * jax.random.normal(k1, (D_NONPROJ, ADAPTER_HID), jnp.float32),
        "w_up":   std * jax.random.normal(k2, (ADAPTER_HID, D_NONPROJ), jnp.float32),
        "bn1_g":  jnp.ones((1, D_NONPROJ), jnp.float32),
        "bn1_b":  jnp.zeros((1, D_NONPROJ), jnp.float32),
        "bn2_g":  jnp.ones((1, D_PROJ), jnp.float32),
        "bn2_b":  jnp.zeros((1, D_PROJ), jnp.float32),
        "w_cls":      std * jax.random.normal(k3, (D_NONPROJ, num_classes), jnp.float32),
        "w_cls_proj": std * jax.random.normal(k4, (D_PROJ, num_classes), jnp.float32),
    }


def _reference(xnp, xp, params):
    """Pure-JAX reference with the same bf16-weight / f32-accumulate recipe."""
    bf16, f32 = jnp.bfloat16, jnp.float32
    h = jnp.maximum(jnp.dot(xnp.astype(bf16), params["w_down"].astype(bf16),
                            preferred_element_type=f32), 0.0)
    a = jnp.maximum(jnp.dot(h.astype(bf16), params["w_up"].astype(bf16),
                            preferred_element_type=f32), 0.0)
    mixed = RATIO * a + (1.0 - RATIO) * xnp
    m1 = jnp.mean(mixed, axis=0, keepdims=True)
    v1 = jnp.mean((mixed - m1) ** 2, axis=0, keepdims=True)
    y1 = params["bn1_g"] * (mixed - m1) * jax.lax.rsqrt(v1 + BN_EPS) + params["bn1_b"]
    m2 = jnp.mean(xp, axis=0, keepdims=True)
    v2 = jnp.mean((xp - m2) ** 2, axis=0, keepdims=True)
    y2 = params["bn2_g"] * (xp - m2) * jax.lax.rsqrt(v2 + BN_EPS) + params["bn2_b"]
    cls = jnp.dot(y1.astype(bf16), params["w_cls"].astype(bf16),
                  preferred_element_type=f32)
    clsp = jnp.dot(y2.astype(bf16), params["w_cls_proj"].astype(bf16),
                   preferred_element_type=f32)
    cat = jnp.concatenate([mixed, xp], axis=1)
    return cls, clsp, cat


if __name__ == "__main__":
    key = jax.random.PRNGKey(0)
    kf1, kf2, kf3, kp = jax.random.split(key, 4)

    B, S, num_classes = 2, 8, 8
    # Simulated CLIP ViT outputs: (last, non_proj, proj) token sequences.
    feat_last = jax.random.normal(kf1, (B, S, D_NONPROJ), jnp.float32)
    feat_non_proj = jax.random.normal(kf2, (B, S, D_NONPROJ), jnp.float32)
    feat_proj = jax.random.normal(kf3, (B, S, D_PROJ), jnp.float32)

    params = init_params(kp, num_classes)

    # One-time weight prep (pad + bf16 cast) hoisted out of the forward path.
    prep, cfg = prepare_params(params)
    head = jax.jit(functools.partial(clip_adapter_head, **cfg))

    # glue: CLS-token slice ([:, 0]) as in the PyTorch forward
    xnp = feat_non_proj[:, 0]   # [B, 768]
    xp = feat_proj[:, 0]        # [B, 512]

    cls_score, cls_score_proj, eval_feat = jax.block_until_ready(
        head(xnp, xp, prep))

    assert cls_score.shape == (B, num_classes)
    assert cls_score_proj.shape == (B, num_classes)
    assert eval_feat.shape == (B, D_NONPROJ + D_PROJ)
    assert bool(jnp.all(jnp.isfinite(cls_score)))
    assert bool(jnp.all(jnp.isfinite(cls_score_proj)))
    assert bool(jnp.all(jnp.isfinite(eval_feat)))

    # Numerical check against a pure-JAX reference (same precision recipe).
    r_cls, r_clsp, r_cat = _reference(xnp, xp, params)
    assert bool(jnp.allclose(cls_score, r_cls, rtol=1e-2, atol=1e-3))
    assert bool(jnp.allclose(cls_score_proj, r_clsp, rtol=1e-2, atol=1e-3))
    assert bool(jnp.allclose(eval_feat, r_cat, rtol=1e-2, atol=1e-3))

    print("KERNEL_OK")
</pallas_src>

<mosaic_0001>
module attributes {stable_mosaic.version = 11 : i64} {
  func.func @_classifier_kernel(%arg0: i32, %arg1: memref<8x768xbf16, #tpu.memory_space<vmem>>, %arg2: memref<8x512xbf16, #tpu.memory_space<vmem>>, %arg3: memref<768x128xbf16, #tpu.memory_space<vmem>>, %arg4: memref<512x128xbf16, #tpu.memory_space<vmem>>, %arg5: memref<8x128xf32, #tpu.memory_space<vmem>>, %arg6: memref<8x128xf32, #tpu.memory_space<vmem>>) attributes {dimension_semantics = [#tpu.dimension_semantics<parallel>], iteration_bounds = array<i64: 1>, scalar_prefetch = 0 : i64, scratch_operands = 0 : i64, tpu.core_type = #tpu.core_type<tc>, window_params = [{pipeline_mode = #tpu.pipeline_mode<synchronous>, transform_indices = @transform_0, window_bounds = array<i64: 8, 768>}, {pipeline_mode = #tpu.pipeline_mode<synchronous>, transform_indices = @transform_1, window_bounds = array<i64: 8, 512>}, {transform_indices = @transform_2, window_bounds = array<i64: 768, 128>}, {transform_indices = @transform_3, window_bounds = array<i64: 512, 128>}, {transform_indices = @transform_4, window_bounds = array<i64: 8, 128>}, {transform_indices = @transform_5, window_bounds = array<i64: 8, 128>}]} {
    %c0 = arith.constant 0 : index
    %c0_0 = arith.constant 0 : index
    %0 = vector.load %arg1[%c0, %c0_0] : memref<8x768xbf16, #tpu.memory_space<vmem>>, vector<8x768xbf16>
    %c0_1 = arith.constant 0 : index
    %c0_2 = arith.constant 0 : index
    %1 = vector.load %arg3[%c0_1, %c0_2] : memref<768x128xbf16, #tpu.memory_space<vmem>>, vector<768x128xbf16>
    %cst = arith.constant dense<0.000000e+00> : vector<8x128xf32>
    %2 = tpu.matmul %0, %1, %cst {dimension_numbers = #tpu.dot_dimension_numbers<[1], [0], [0], [1], [0, 0, 1, 1], [], []>} : vector<8x768xbf16>, vector<768x128xbf16>, vector<8x128xf32> -> vector<8x128xf32>
    %c0_3 = arith.constant 0 : index
    %c0_4 = arith.constant 0 : index
    %3 = vector.load %arg5[%c0_3, %c0_4] : memref<8x128xf32, #tpu.memory_space<vmem>>, vector<8x128xf32>
    tpu.vector_store %arg5[%c0_3, %c0_4], %2 {strides = array<i32>} : memref<8x128xf32, #tpu.memory_space<vmem>>, vector<8x128xf32>,
    %c0_5 = arith.constant 0 : index
    %c0_6 = arith.constant 0 : index
    %4 = vector.load %arg2[%c0_5, %c0_6] : memref<8x512xbf16, #tpu.memory_space<vmem>>, vector<8x512xbf16>
    %c0_7 = arith.constant 0 : index
    %c0_8 = arith.constant 0 : index
    %5 = vector.load %arg4[%c0_7, %c0_8] : memref<512x128xbf16, #tpu.memory_space<vmem>>, vector<512x128xbf16>
    %cst_9 = arith.constant dense<0.000000e+00> : vector<8x128xf32>
    %6 = tpu.matmul %4, %5, %cst_9 {dimension_numbers = #tpu.dot_dimension_numbers<[1], [0], [0], [1], [0, 0, 1, 1], [], []>} : vector<8x512xbf16>, vector<512x128xbf16>, vector<8x128xf32> -> vector<8x128xf32>
    %c0_10 = arith.constant 0 : index
    %c0_11 = arith.constant 0 : index
    %7 = vector.load %arg6[%c0_10, %c0_11] : memref<8x128xf32, #tpu.memory_space<vmem>>, vector<8x128xf32>
    tpu.vector_store %arg6[%c0_10, %c0_11], %6 {strides = array<i32>} : memref<8x128xf32, #tpu.memory_space<vmem>>, vector<8x128xf32>,
    return
  }
  func.func @transform_0(%arg0: i32) -> (i32, i32) {
    %c0_i32 = arith.constant 0 : i32
    %c0_i32_0 = arith.constant 0 : i32
    %c0_i32_1 = arith.constant 0 : i32
    return %c0_i32, %c0_i32_0 : i32, i32
  }
  func.func @transform_1(%arg0: i32) -> (i32, i32) {
    %c0_i32 = arith.constant 0 : i32
    %c0_i32_0 = arith.constant 0 : i32
    %c0_i32_1 = arith.constant 0 : i32
    return %c0_i32, %c0_i32_0 : i32, i32
  }
  func.func @transform_2(%arg0: i32) -> (i32, i32) {
    %c0_i32 = arith.constant 0 : i32
    %c0_i32_0 = arith.constant 0 : i32
    return %c0_i32, %arg0 : i32, i32
  }
  func.func @transform_3(%arg0: i32) -> (i32, i32) {
    %c0_i32 = arith.constant 0 : i32
    %c0_i32_0 = arith.constant 0 : i32
    return %c0_i32, %arg0 : i32, i32
  }
  func.func @transform_4(%arg0: i32) -> (i32, i32) {
    %c0_i32 = arith.constant 0 : i32
    %c0_i32_0 = arith.constant 0 : i32
    return %c0_i32, %arg0 : i32, i32
  }
  func.func @transform_5(%arg0: i32) -> (i32, i32) {
    %c0_i32 = arith.constant 0 : i32
    %c0_i32_0 = arith.constant 0 : i32
    return %c0_i32, %arg0 : i32, i32
  }
}

module attributes {stable_mosaic.version = 11 : i64} {
  func.func @_batch_head_kernel(%arg0: i32, %arg1: memref<1xi32, #tpu.memory_space<smem>>, %arg2: memref<8x768xf32, #tpu.memory_space<vmem>>, %arg3: memref<8x512xf32, #tpu.memory_space<vmem>>, %arg4: memref<768x256xbf16, #tpu.memory_space<vmem>>, %arg5: memref<256x768xbf16, #tpu.memory_space<vmem>>, %arg6: memref<1x768xf32, #tpu.memory_space<vmem>>, %arg7: memref<1x768xf32, #tpu.memory_space<vmem>>, %arg8: memref<1x512xf32, #tpu.memory_space<vmem>>, %arg9: memref<1x512xf32, #tpu.memory_space<vmem>>, %arg10: memref<8x768xbf16, #tpu.memory_space<vmem>>, %arg11: memref<8x512xbf16, #tpu.memory_space<vmem>>, %arg12: memref<8x1280xf32, #tpu.memory_space<vmem>>) attributes {dimension_semantics = [#tpu.dimension_semantics<arbitrary>], iteration_bounds = array<i64: 1>, scalar_prefetch = 1 : i64, scratch_operands = 0 : i64, tpu.core_type = #tpu.core_type<tc>, window_params = [{pipeline_mode = #tpu.pipeline_mode<synchronous>, transform_indices = @transform_0, window_bounds = array<i64: 8, 768>}, {pipeline_mode = #tpu.pipeline_mode<synchronous>, transform_indices = @transform_1, window_bounds = array<i64: 8, 512>}, {pipeline_mode = #tpu.pipeline_mode<synchronous>, transform_indices = @transform_2, window_bounds = array<i64: 768, 256>}, {pipeline_mode = #tpu.pipeline_mode<synchronous>, transform_indices = @transform_3, window_bounds = array<i64: 256, 768>}, {pipeline_mode = #tpu.pipeline_mode<synchronous>, transform_indices = @transform_4, window_bounds = array<i64: 1, 768>}, {pipeline_mode = #tpu.pipeline_mode<synchronous>, transform_indices = @transform_5, window_bounds = array<i64: 1, 768>}, {pipeline_mode = #tpu.pipeline_mode<synchronous>, transform_indices = @transform_6, window_bounds = array<i64: 1, 512>}, {pipeline_mode = #tpu.pipeline_mode<synchronous>, transform_indices = @transform_7, window_bounds = array<i64: 1, 512>}, {pipeline_mode = #tpu.pipeline_mode<synchronous>, transform_indices = @transform_8, window_bounds = array<i64: 8, 768>}, {pipeline_mode = #tpu.pipeline_mode<synchronous>, transform_indices = @transform_9, window_bounds = array<i64: 8, 512>}, {pipeline_mode = #tpu.pipeline_mode<synchronous>, transform_indices = @transform_10, window_bounds = array<i64: 8, 1280>}]} {
    %c0 = arith.constant 0 : index
    %c0_0 = arith.constant 0 : index
    %0 = vector.load %arg2[%c0, %c0_0] : memref<8x768xf32, #tpu.memory_space<vmem>>, vector<8x768xf32>
    %c0_1 = arith.constant 0 : index
    %c0_2 = arith.constant 0 : index
    %1 = vector.load %arg3[%c0_1, %c0_2] : memref<8x512xf32, #tpu.memory_space<vmem>>, vector<8x512xf32>
    %2 = arith.truncf %0 : vector<8x768xf32> to vector<8x768xbf16>
    %c0_3 = arith.constant 0 : index
    %c0_4 = arith.constant 0 : index
    %3 = vector.load %arg4[%c0_3, %c0_4] : memref<768x256xbf16, #tpu.memory_space<vmem>>, vector<768x256xbf16>
    %cst = arith.constant dense<0.000000e+00> : vector<8x256xf32>
    %4 = tpu.matmul %2, %3, %cst {dimension_numbers = #tpu.dot_dimension_numbers<[1], [0], [0], [1], [0, 0, 1, 1], [], []>} : vector<8x768xbf16>, vector<768x256xbf16>, vector<8x256xf32> -> vector<8x256xf32>
    %cst_5 = arith.constant 0.000000e+00 : f32
    %5 = vector.broadcast %cst_5 : f32 to vector<8x256xf32>
    %6 = arith.maximumf %4, %5 : vector<8x256xf32>
    %7 = arith.truncf %6 : vector<8x256xf32> to vector<8x256xbf16>
    %c0_6 = arith.constant 0 : index
    %c0_7 = arith.constant 0 : index
    %8 = vector.load %arg5[%c0_6, %c0_7] : memref<256x768xbf16, #tpu.memory_space<vmem>>, vector<256x768xbf16>
    %cst_8 = arith.constant dense<0.000000e+00> : vector<8x768xf32>
    %9 = tpu.matmul %7, %8, %cst_8 {dimension_numbers = #tpu.dot_dimension_numbers<[1], [0], [0], [1], [0, 0, 1, 1], [], []>} : vector<8x256xbf16>, vector<256x768xbf16>, vector<8x768xf32> -> vector<8x768xf32>
    %cst_9 = arith.constant 0.000000e+00 : f32
    %10 = vector.broadcast %cst_9 : f32 to vector<8x768xf32>
    %11 = arith.maximumf %9, %10 : vector<8x768xf32>
    %cst_10 = arith.constant 2.000000e-01 : f32
    %12 = vector.broadcast %cst_10 : f32 to vector<8x768xf32>
    %13 = arith.mulf %12, %11 : vector<8x768xf32>
    %cst_11 = arith.constant 8.000000e-01 : f32
    %14 = vector.broadcast %cst_11 : f32 to vector<8x768xf32>
    %15 = arith.mulf %14, %0 : vector<8x768xf32>
    %16 = arith.addf %13, %15 : vector<8x768xf32>
    %c0_12 = arith.constant 0 : index
    %17 = memref.load %arg1[%c0_12] : memref<1xi32, #tpu.memory_space<smem>>
    %18 = tpu.iota {dimensions = array<i32: 0>} : vector<8x1xi32>
    %19 = vector.broadcast %17 : i32 to vector<8x1xi32>
    %20 = arith.cmpi slt, %18, %19 : vector<8x1xi32>
    %21 = arith.extui %20 : vector<8x1xi1> to vector<8x1xi32>
    %22 = arith.sitofp %21 : vector<8x1xi32> to vector<8x1xf32>
    %23 = arith.sitofp %17 : i32 to f32
    %cst_13 = arith.constant 1.000000e+00 : f32
    %24 = arith.divf %cst_13, %23 : f32
    %25 = vector.broadcast %22 : vector<8x1xf32> to vector<8x768xf32>
    %26 = arith.mulf %16, %25 : vector<8x768xf32>
    %cst_14 = arith.constant dense<0.000000e+00> : vector<768xf32>
    %27 = vector.multi_reduction <add>, %26, %cst_14 [0] : vector<8x768xf32> to vector<768xf32>
    %28 = vector.shape_cast %27 : vector<768xf32> to vector<1x768xf32>
    %29 = vector.broadcast %24 : f32 to vector<1x768xf32>
    %30 = arith.mulf %28, %29 : vector<1x768xf32>
    %31 = vector.broadcast %30 : vector<1x768xf32> to vector<8x768xf32>
    %32 = arith.subf %16, %31 : vector<8x768xf32>
    %33 = vector.broadcast %22 : vector<8x1xf32> to vector<8x768xf32>
    %34 = arith.mulf %32, %33 : vector<8x768xf32>
    %35 = arith.mulf %34, %34 : vector<8x768xf32>
    %cst_15 = arith.constant dense<0.000000e+00> : vector<768xf32>
    %36 = vector.multi_reduction <add>, %35, %cst_15 [0] : vector<8x768xf32> to vector<768xf32>
    %37 = vector.shape_cast %36 : vector<768xf32> to vector<1x768xf32>
    %38 = vector.broadcast %24 : f32 to vector<1x768xf32>
    %39 = arith.mulf %37, %38 : vector<1x768xf32>
    %c0_16 = arith.constant 0 : index
    %c0_17 = arith.constant 0 : index
    %40 = vector.load %arg6[%c0_16, %c0_17] : memref<1x768xf32, #tpu.memory_space<vmem>>, vector<1x768xf32>
    %41 = vector.broadcast %30 : vector<1x768xf32> to vector<8x768xf32>
    %42 = arith.subf %16, %41 : vector<8x768xf32>
    %43 = vector.broadcast %40 : vector<1x768xf32> to vector<8x768xf32>
    %44 = arith.mulf %43, %42 : vector<8x768xf32>
    %cst_18 = arith.constant 9.99999974E-6 : f32
    %45 = vector.broadcast %cst_18 : f32 to vector<1x768xf32>
    %46 = arith.addf %39, %45 : vector<1x768xf32>
    %47 = math.rsqrt %46 : vector<1x768xf32>
    %48 = vector.broadcast %47 : vector<1x768xf32> to vector<8x768xf32>
    %49 = arith.mulf %44, %48 : vector<8x768xf32>
    %c0_19 = arith.constant 0 : index
    %c0_20 = arith.constant 0 : index
    %50 = vector.load %arg7[%c0_19, %c0_20] : memref<1x768xf32, #tpu.memory_space<vmem>>, vector<1x768xf32>
    %51 = vector.broadcast %50 : vector<1x768xf32> to vector<8x768xf32>
    %52 = arith.addf %49, %51 : vector<8x768xf32>
    %53 = vector.broadcast %22 : vector<8x1xf32> to vector<8x512xf32>
    %54 = arith.mulf %1, %53 : vector<8x512xf32>
    %cst_21 = arith.constant dense<0.000000e+00> : vector<512xf32>
    %55 = vector.multi_reduction <add>, %54, %cst_21 [0] : vector<8x512xf32> to vector<512xf32>
    %56 = vector.shape_cast %55 : vector<512xf32> to vector<1x512xf32>
    %57 = vector.broadcast %24 : f32 to vector<1x512xf32>
    %58 = arith.mulf %56, %57 : vector<1x512xf32>
    %59 = vector.broadcast %58 : vector<1x512xf32> to vector<8x512xf32>
    %60 = arith.subf %1, %59 : vector<8x512xf32>
    %61 = vector.broadcast %22 : vector<8x1xf32> to vector<8x512xf32>
    %62 = arith.mulf %60, %61 : vector<8x512xf32>
    %63 = arith.mulf %62, %62 : vector<8x512xf32>
    %cst_22 = arith.constant dense<0.000000e+00> : vector<512xf32>
    %64 = vector.multi_reduction <add>, %63, %cst_22 [0] : vector<8x512xf32> to vector<512xf32>
    %65 = vector.shape_cast %64 : vector<512xf32> to vector<1x512xf32>
    %66 = vector.broadcast %24 : f32 to vector<1x512xf32>
    %67 = arith.mulf %65, %66 : vector<1x512xf32>
    %c0_23 = arith.constant 0 : index
    %c0_24 = arith.constant 0 : index
    %68 = vector.load %arg8[%c0_23, %c0_24] : memref<1x512xf32, #tpu.memory_space<vmem>>, vector<1x512xf32>
    %69 = vector.broadcast %58 : vector<1x512xf32> to vector<8x512xf32>
    %70 = arith.subf %1, %69 : vector<8x512xf32>
    %71 = vector.broadcast %68 : vector<1x512xf32> to vector<8x512xf32>
    %72 = arith.mulf %71, %70 : vector<8x512xf32>
    %cst_25 = arith.constant 9.99999974E-6 : f32
    %73 = vector.broadcast %cst_25 : f32 to vector<1x512xf32>
    %74 = arith.addf %67, %73 : vector<1x512xf32>
    %75 = math.rsqrt %74 : vector<1x512xf32>
    %76 = vector.broadcast %75 : vector<1x512xf32> to vector<8x512xf32>
    %77 = arith.mulf %72, %76 : vector<8x512xf32>
    %c0_26 = arith.constant 0 : index
    %c0_27 = arith.constant 0 : index
    %78 = vector.load %arg9[%c0_26, %c0_27] : memref<1x512xf32, #tpu.memory_space<vmem>>, vector<1x512xf32>
    %79 = vector.broadcast %78 : vector<1x512xf32> to vector<8x512xf32>
    %80 = arith.addf %77, %79 : vector<8x512xf32>
    %81 = arith.truncf %52 : vector<8x768xf32> to vector<8x768xbf16>
    %c0_28 = arith.constant 0 : index
    %c0_29 = arith.constant 0 : index
    %82 = vector.load %arg10[%c0_28, %c0_29] : memref<8x768xbf16, #tpu.memory_space<vmem>>, vector<8x768xbf16>
    tpu.vector_store %arg10[%c0_28, %c0_29], %81 {strides = array<i32>} : memref<8x768xbf16, #tpu.memory_space<vmem>>, vector<8x768xbf16>,
    %83 = arith.truncf %80 : vector<8x512xf32> to vector<8x512xbf16>
    %c0_30 = arith.constant 0 : index
    %c0_31 = arith.constant 0 : index
    %84 = vector.load %arg11[%c0_30, %c0_31] : memref<8x512xbf16, #tpu.memory_space<vmem>>, vector<8x512xbf16>
    tpu.vector_store %arg11[%c0_30, %c0_31], %83 {strides = array<i32>} : memref<8x512xbf16, #tpu.memory_space<vmem>>, vector<8x512xbf16>,
    %c0_32 = arith.constant 0 : index
    %c0_33 = arith.constant 0 : index
    %85 = vector.load %arg12[%c0_32, %c0_33] : memref<8x1280xf32, #tpu.memory_space<vmem>>, vector<8x768xf32>
    tpu.vector_store %arg12[%c0_32, %c0_33], %16 {strides = array<i32>} : memref<8x1280xf32, #tpu.memory_space<vmem>>, vector<8x768xf32>,
    %c0_34 = arith.constant 0 : index
    %c768 = arith.constant 768 : index
    %86 = vector.load %arg12[%c0_34, %c768] : memref<8x1280xf32, #tpu.memory_space<vmem>>, vector<8x512xf32>
    tpu.vector_store %arg12[%c0_34, %c768], %1 {strides = array<i32>} : memref<8x1280xf32, #tpu.memory_space<vmem>>, vector<8x512xf32>,
    return
  }
  func.func @transform_0(%arg0: i32, %arg1: memref<1xi32, #tpu.memory_space<smem>>) -> (i32, i32) {
    %c0_i32 = arith.constant 0 : i32
    %c0_i32_0 = arith.constant 0 : i32
    %c0_i32_1 = arith.constant 0 : i32
    return %c0_i32, %c0_i32_0 : i32, i32
  }
  func.func @transform_1(%arg0: i32, %arg1: memref<1xi32, #tpu.memory_space<smem>>) -> (i32, i32) {
    %c0_i32 = arith.constant 0 : i32
    %c0_i32_0 = arith.constant 0 : i32
    %c0_i32_1 = arith.constant 0 : i32
    return %c0_i32, %c0_i32_0 : i32, i32
  }
  func.func @transform_2(%arg0: i32, %arg1: memref<1xi32, #tpu.memory_space<smem>>) -> (i32, i32) {
    %c0_i32 = arith.constant 0 : i32
    %c0_i32_0 = arith.constant 0 : i32
    %c0_i32_1 = arith.constant 0 : i32
    return %c0_i32, %c0_i32_0 : i32, i32
  }
  func.func @transform_3(%arg0: i32, %arg1: memref<1xi32, #tpu.memory_space<smem>>) -> (i32, i32) {
    %c0_i32 = arith.constant 0 : i32
    %c0_i32_0 = arith.constant 0 : i32
    %c0_i32_1 = arith.constant 0 : i32
    return %c0_i32, %c0_i32_0 : i32, i32
  }
  func.func @transform_4(%arg0: i32, %arg1: memref<1xi32, #tpu.memory_space<smem>>) -> (i32, i32) {
    %c0_i32 = arith.constant 0 : i32
    %c0_i32_0 = arith.constant 0 : i32
    %c0_i32_1 = arith.constant 0 : i32
    return %c0_i32, %c0_i32_0 : i32, i32
  }
  func.func @transform_5(%arg0: i32, %arg1: memref<1xi32, #tpu.memory_space<smem>>) -> (i32, i32) {
    %c0_i32 = arith.constant 0 : i32
    %c0_i32_0 = arith.constant 0 : i32
    %c0_i32_1 = arith.constant 0 : i32
    return %c0_i32, %c0_i32_0 : i32, i32
  }
  func.func @transform_6(%arg0: i32, %arg1: memref<1xi32, #tpu.memory_space<smem>>) -> (i32, i32) {
    %c0_i32 = arith.constant 0 : i32
    %c0_i32_0 = arith.constant 0 : i32
    %c0_i32_1 = arith.constant 0 : i32
    return %c0_i32, %c0_i32_0 : i32, i32
  }
  func.func @transform_7(%arg0: i32, %arg1: memref<1xi32, #tpu.memory_space<smem>>) -> (i32, i32) {
    %c0_i32 = arith.constant 0 : i32
    %c0_i32_0 = arith.constant 0 : i32
    %c0_i32_1 = arith.constant 0 : i32
    return %c0_i32, %c0_i32_0 : i32, i32
  }
  func.func @transform_8(%arg0: i32, %arg1: memref<1xi32, #tpu.memory_space<smem>>) -> (i32, i32) {
    %c0_i32 = arith.constant 0 : i32
    %c0_i32_0 = arith.constant 0 : i32
    %c0_i32_1 = arith.constant 0 : i32
    return %c0_i32, %c0_i32_0 : i32, i32
  }
  func.func @transform_9(%arg0: i32, %arg1: memref<1xi32, #tpu.memory_space<smem>>) -> (i32, i32) {
    %c0_i32 = arith.constant 0 : i32
    %c0_i32_0 = arith.constant 0 : i32
    %c0_i32_1 = arith.constant 0 : i32
    return %c0_i32, %c0_i32_0 : i32, i32
  }
  func.func @transform_10(%arg0: i32, %arg1: memref<1xi32, #tpu.memory_space<smem>>) -> (i32, i32) {
    %c0_i32 = arith.constant 0 : i32
    %c0_i32_0 = arith.constant 0 : i32
    %c0_i32_1 = arith.constant 0 : i32
    return %c0_i32, %c0_i32_0 : i32, i32
  }
}

</mosaic_0001>

<bundles_post_ra>
// kernel: clip_adapter_head.3
= control target key start
LH: loop header
LB: loop body
LE: loop exit
PB: predicated region body
PF: predicated region fallthrough
CT: control target
= control target key end

     0   :  { %s1491_s2 = inlined_call_operand.vmem [shape: bf16[768,128], index: 2, kind: input, shape index: {}]   ;;  %s1492_s0 = inlined_call_operand.vmem [shape: bf16[8,768], index: 0, kind: input, shape index: {}]   ;;  %s1493_s3 = inlined_call_operand.vmem [shape: bf16[512,128], index: 3, kind: input, shape index: {}]   ;;  %s1494_s1 = inlined_call_operand.vmem [shape: bf16[8,512], index: 1, kind: input, shape index: {}]   ;;  %s1495_s4 = inlined_call_operand.vmem [shape: f32[8,128], index: 4, kind: output, shape index: {0}]   ;;  %s1496_s5 = inlined_call_operand.vmem [shape: f32[8,128], index: 5, kind: output, shape index: {1}]  }
   0x1   :  { %v1110_v0 = vld [vmem:[%s1491_s2 + $0x40] sm:$0xff]   ;;  %v1114_v4 = vld [vmem:[%s1491_s2 + $0x48] sm:$0xff]   ;;  %v1118_v8 = vld [vmem:[%s1491_s2 + $0x50] sm:$0xff]  }
   0x2   :  { %v1111_v1 = vld [vmem:[%s1491_s2 + $0xc0] sm:$0xff]   ;;  %1000 = vmatprep.subr.bf16.mxu0 %v1110_v0  ;;  %v1115_v5 = vld [vmem:[%s1491_s2 + $0xc8] sm:$0xff]   ;;  %v1119_v9 = vld [vmem:[%s1491_s2 + $0xd0] sm:$0xff]  }
   0x3   :  { %v1112_v2 = vld [vmem:[%s1491_s2] sm:$0xff]   ;;  %1022 = vmatprep.subr.bf16.mxu1 %v1111_v1  ;;  %v1116_v6 = vld [vmem:[%s1491_s2 + $0x8] sm:$0xff]   ;;  %v1120_v10 = vld [vmem:[%s1491_s2 + $0x10] sm:$0xff]  }
   0x4   :  { %v1113_v3 = vld [vmem:[%s1491_s2 + $0x80] sm:$0xff]   ;;  %1001 = vmatpush3.bf16.msra.mxu0 %v1112_v2  ;;  %v1117_v7 = vld [vmem:[%s1491_s2 + $0x88] sm:$0xff]   ;;  %v1121_v11 = vld [vmem:[%s1491_s2 + $0x90] sm:$0xff]  }
   0x5   :  { %1023 = vmatpush3.bf16.msra.mxu1 %v1113_v3  ;;  %1002 = vmatprep.subr.bf16.mxu0 %v1114_v4  ;;  %v1122_v12 = vld [vmem:[%s1491_s2 + $0x58] sm:$0xff]   ;;  %v1126_v16 = vld [vmem:[%s1491_s2 + $0x60] sm:$0xff]   ;;  %v1130_v20 = vld [vmem:[%s1491_s2 + $0x68] sm:$0xff]  }
   0x6   :  { %1024 = vmatprep.subr.bf16.mxu1 %v1115_v5  ;;  %v1123_v13 = vld [vmem:[%s1491_s2 + $0xd8] sm:$0xff]   ;;  %v1127_v17 = vld [vmem:[%s1491_s2 + $0xe0] sm:$0xff]   ;;  %v1131_v21 = vld [vmem:[%s1491_s2 + $0xe8] sm:$0xff]  }
   0x7   :  { %v1124_v14 = vld [vmem:[%s1491_s2 + $0x18] sm:$0xff]   ;;  %v1128_v18 = vld [vmem:[%s1491_s2 + $0x20] sm:$0xff]   ;;  %v1132_v22 = vld [vmem:[%s1491_s2 + $0x28] sm:$0xff]  }
   0x8   :  { %1003 = vmatpush3.bf16.msra.mxu0 %v1116_v6  ;;  %v1125_v15 = vld [vmem:[%s1491_s2 + $0x98] sm:$0xff]   ;;  %v1129_v19 = vld [vmem:[%s1491_s2 + $0xa0] sm:$0xff]   ;;  %v1133_v23 = vld [vmem:[%s1491_s2 + $0xa8] sm:$0xff]  }
   0x9   :  { %1025 = vmatpush3.bf16.msra.mxu1 %v1117_v7  ;;  %1004 = vmatprep.subr.bf16.mxu0 %v1118_v8  ;;  %v1134_v24 = vld [vmem:[%s1491_s2 + $0x70] sm:$0xff]   ;;  %v1138_v28 = vld [vmem:[%s1491_s2 + $0x78] sm:$0xff]   ;;  %v20_v32 = vld [vmem:[%s1492_s0] sm:$0xff] }
   0xa   :  { %1026 = vmatprep.subr.bf16.mxu1 %v1119_v9  ;;  %v1135_v25 = vld [vmem:[%s1491_s2 + $0xf0] sm:$0xff]   ;;  %v1139_v29 = vld [vmem:[%s1491_s2 + $0xf8] sm:$0xff]   ;;  %v21_v33 = vld [vmem:[%s1492_s0 + $0x8] sm:$0xff]  ;;  %v910_v34 = vcombine.low %v20_v32, %v20_v32  ;;  %v911_v35 = vcombine.high %v20_v32, %v20_v32 }
   0xb   :  { %v1136_v26 = vld [vmem:[%s1491_s2 + $0x30] sm:$0xff]   ;;  %v1140_v30 = vld [vmem:[%s1491_s2 + $0x38] sm:$0xff]   ;;  %v912_v36 = vcombine.low %v21_v33, %v21_v33  ;;  %v913_v37 = vcombine.high %v21_v33, %v21_v33  ;;  %v1146_v38 = vld [vmem:[%s1491_s2 + $0x140] sm:$0xff]  }
   0xc   :  { %1005 = vmatpush3.bf16.msra.mxu0 %v1120_v10  ;;  %v1137_v27 = vld [vmem:[%s1491_s2 + $0xb0] sm:$0xff]   ;;  %v1141_v31 = vld [vmem:[%s1491_s2 + $0xb8] sm:$0xff]   ;;  %v1147_v39 = vld [vmem:[%s1491_s2 + $0x100] sm:$0xff]   ;;  %460 = vmatprep.mubr.bf16.mxu0 %v911_v35 }
   0xd   :  { %1027 = vmatpush3.bf16.msra.mxu1 %v1121_v11  ;;  %1006 = vmatprep.subr.bf16.mxu0 %v1122_v12  ;;  %v1148_v40 = vld [vmem:[%s1491_s2 + $0x148] sm:$0xff]   ;;  %v1150_v42 = vld [vmem:[%s1491_s2 + $0x150] sm:$0xff]   ;;  %v1152_v44 = vld [vmem:[%s1491_s2 + $0x158] sm:$0xff]  }
   0xe   :  { %1028 = vmatprep.subr.bf16.mxu1 %v1123_v13  ;;  %500 = vmatprep.mubr.bf16.mxu1 %v913_v37  ;;  %v1149_v41 = vld [vmem:[%s1491_s2 + $0x108] sm:$0xff]   ;;  %v1151_v43 = vld [vmem:[%s1491_s2 + $0x110] sm:$0xff]   ;;  %v1153_v45 = vld [vmem:[%s1491_s2 + $0x118] sm:$0xff]  }
   0xf   :  { %v1154_v46 = vld [vmem:[%s1491_s2 + $0x160] sm:$0xff]   ;;  %v22_v50 = vld [vmem:[%s1492_s0 + $0x10] sm:$0xff]  ;;  %v1156_v51 = vld [vmem:[%s1491_s2 + $0x168] sm:$0xff]  }
  0x10   :  { %1007 = vmatpush3.bf16.msra.mxu0 %v1124_v14  ;;  %v1155_v47 = vld [vmem:[%s1491_s2 + $0x120] sm:$0xff]   ;;  %v915_v52 = vcombine.high %v22_v50, %v22_v50  ;;  %v1167_v53 = vld [vmem:[%s1493_s3 + $0x48] sm:$0xff]   ;;  %v1158_v56 = vld [vmem:[%s1491_s2 + $0x170] sm:$0xff]   ;;  %v914_v2 = vcombine.low %v22_v50, %v22_v50 }
  0x11   :  { %1029 = vmatpush3.bf16.msra.mxu1 %v1125_v15  ;;  %1008 = vmatprep.subr.bf16.mxu0 %v1126_v16  ;;  %v1162_v48 = vld [vmem:[%s1493_s3 + $0x40] sm:$0xff]   ;;  %v1157_v54 = vld [vmem:[%s1491_s2 + $0x128] sm:$0xff]   ;;  %v1171_v57 = vld [vmem:[%s1493_s3 + $0x50] sm:$0xff]  }
  0x12   :  { %1030 = vmatprep.subr.bf16.mxu1 %v1127_v17  ;;  %v1163_v49 = vld [vmem:[%s1493_s3] sm:$0xff]   ;;  %v1169_v55 = vld [vmem:[%s1493_s3 + $0x8] sm:$0xff]   ;;  %v1159_v58 = vld [vmem:[%s1491_s2 + $0x130] sm:$0xff]  }
  0x13   :  { %v1173_v59 = vld [vmem:[%s1493_s3 + $0x10] sm:$0xff]   ;;  %v1160_v60 = vld [vmem:[%s1491_s2 + $0x178] sm:$0xff]   ;;  %v1166_v0 = vld [vmem:[%s1493_s3 + $0xc0] sm:$0xff]  }
  0x14   :  { %1009 = vmatpush3.bf16.msra.mxu0 %v1128_v18  ;;  %v1175_v61 = vld [vmem:[%s1493_s3 + $0x58] sm:$0xff]   ;;  %v1179_v1 = vld [vmem:[%s1493_s3 + $0x60] sm:$0xff]   ;;  %v1170_v5 = vld [vmem:[%s1493_s3 + $0xc8] sm:$0xff]  }
  0x15   :  { %1031 = vmatpush3.bf16.msra.mxu1 %v1129_v19  ;;  %1010 = vmatprep.subr.bf16.mxu0 %v1130_v20  ;;  %v1161_v62 = vld [vmem:[%s1491_s2 + $0x138] sm:$0xff]   ;;  %v1168_v3 = vld [vmem:[%s1493_s3 + $0x80] sm:$0xff]   ;;  %v1183_v6 = vld [vmem:[%s1493_s3 + $0x68] sm:$0xff]  }
  0x16   :  { %1032 = vmatprep.subr.bf16.mxu1 %v1131_v21  ;;  %v1177_v63 = vld [vmem:[%s1493_s3 + $0x18] sm:$0xff]   ;;  %v1181_v4 = vld [vmem:[%s1493_s3 + $0x20] sm:$0xff]   ;;  %v1172_v7 = vld [vmem:[%s1493_s3 + $0x88] sm:$0xff]  }
  0x17   :  { %v1185_v8 = vld [vmem:[%s1493_s3 + $0x28] sm:$0xff]   ;;  %v1174_v9 = vld [vmem:[%s1493_s3 + $0xd0] sm:$0xff]   ;;  %v1178_v13 = vld [vmem:[%s1493_s3 + $0xd8] sm:$0xff]  }
  0x18   :  { %1011 = vmatpush3.bf16.msra.mxu0 %v1132_v22  ;;  %v1187_v10 = vld [vmem:[%s1493_s3 + $0x70] sm:$0xff]   ;;  %v1180_v14 = vld [vmem:[%s1493_s3 + $0x98] sm:$0xff]   ;;  %v1182_v16 = vld [vmem:[%s1493_s3 + $0xe0] sm:$0xff]  }
  0x19   :  { %1033 = vmatpush3.bf16.msra.mxu1 %v1133_v23  ;;  %1012 = vmatprep.subr.bf16.mxu0 %v1134_v24  ;;  %v1176_v11 = vld [vmem:[%s1493_s3 + $0x90] sm:$0xff]   ;;  %v1191_v15 = vld [vmem:[%s1493_s3 + $0x78] sm:$0xff]   ;;  %v549_v18 = vld [vmem:[%s1494_s1] sm:$0xff] }
  0x1a   :  { %1034 = vmatprep.subr.bf16.mxu1 %v1135_v25  ;;  %v1189_v12 = vld [vmem:[%s1493_s3 + $0x30] sm:$0xff]   ;;  %v1193_v17 = vld [vmem:[%s1493_s3 + $0x38] sm:$0xff]   ;;  %v964_v19 = vcombine.low %v549_v18, %v549_v18  ;;  %v965_v20 = vcombine.high %v549_v18, %v549_v18  ;;  %v550_v21 = vld [vmem:[%s1494_s1 + $0x8] sm:$0xff] }
  0x1b   :  { %v1184_v22 = vld [vmem:[%s1493_s3 + $0xa0] sm:$0xff]   ;;  %v967_v23 = vcombine.high %v550_v21, %v550_v21  ;;  %v1186_v24 = vld [vmem:[%s1493_s3 + $0xe8] sm:$0xff]  }
  0x1c   :  { %1013 = vmatpush3.bf16.msra.mxu0 %v1136_v26  ;;  %v1188_v25 = vld [vmem:[%s1493_s3 + $0xa8] sm:$0xff]   ;;  %v1190_v26 = vld [vmem:[%s1493_s3 + $0xf0] sm:$0xff]  }
  0x1d   :  { %1035 = vmatpush3.bf16.msra.mxu1 %v1137_v27  ;;  %1014 = vmatprep.subr.bf16.mxu0 %v1138_v28  ;;  %v1192_v27 = vld [vmem:[%s1493_s3 + $0xb0] sm:$0xff]   ;;  %v1196_v28 = vld [vmem:[%s1493_s3 + $0xf8] sm:$0xff]  }
  0x1e   :  { %1036 = vmatprep.subr.bf16.mxu1 %v1139_v29  ;;  %v1197_v29 = vld [vmem:[%s1493_s3 + $0xb8] sm:$0xff]  }
  0x20   :  { %1015 = vmatpush3.bf16.msra.mxu0 %v1140_v30  ;;  %v966_v30 = vcombine.low %v550_v21, %v550_v21 }
  0x21   :  { %1037 = vmatpush3.bf16.msra.mxu1 %v1141_v31  ;;  %1044 = vmatprep.subr.bf16.mxu0 %v1146_v38 }
  0x22   :  { %1066 = vmatprep.subr.bf16.mxu1 %v1162_v48 }
  0x23   :  { %461 = vmatmul.mubr.bf16.vlgmr.msra.gmra.mrb[0].mxu0 %v910_v34 }
  0x24   :  { %501 = vmatmul.mubr.bf16.vlgmr.msra.gmra.mrb[0].mxu1 %v912_v36  ;;  %1045 = vmatpush3.bf16.msra.mxu0 %v1147_v39 }
  0x25   :  { %1046 = vmatprep.subr.bf16.mxu0 %v1148_v40  ;;  %1067 = vmatpush3.bf16.msra.mxu1 %v1163_v49 }
  0x26   :  { %540 = vmatprep.mubr.bf16.mxu0 %v915_v52  ;;  %1068 = vmatprep.subr.bf16.mxu1 %v1167_v53 }
  0x27   :  { %853 = vmatprep.mubr.bf16.mxu1 %v965_v20 }
  0x28   :  { %1047 = vmatpush3.bf16.msra.mxu0 %v1149_v41 }
  0x29   :  { %1048 = vmatprep.subr.bf16.mxu0 %v1150_v42  ;;  %1069 = vmatpush3.bf16.msra.mxu1 %v1169_v55 }
  0x2a   :  { %1070 = vmatprep.subr.bf16.mxu1 %v1171_v57 }
  0x2c   :  { %1049 = vmatpush3.bf16.msra.mxu0 %v1151_v43 }
  0x2d   :  { %1050 = vmatprep.subr.bf16.mxu0 %v1152_v44  ;;  %1071 = vmatpush3.bf16.msra.mxu1 %v1173_v59 }
  0x2e   :  { %1072 = vmatprep.subr.bf16.mxu1 %v1175_v61 }
  0x30   :  { %1051 = vmatpush3.bf16.msra.mxu0 %v1153_v45 }
  0x31   :  { %1052 = vmatprep.subr.bf16.mxu0 %v1154_v46  ;;  %1073 = vmatpush3.bf16.msra.mxu1 %v1177_v63 }
  0x32   :  { %1074 = vmatprep.subr.bf16.mxu1 %v1179_v1 }
  0x34   :  { %1053 = vmatpush3.bf16.msra.mxu0 %v1155_v47 }
  0x35   :  { %1054 = vmatprep.subr.bf16.mxu0 %v1156_v51  ;;  %1075 = vmatpush3.bf16.msra.mxu1 %v1181_v4 }
  0x36   :  { %1076 = vmatprep.subr.bf16.mxu1 %v1183_v6 }
  0x38   :  { %1055 = vmatpush3.bf16.msra.mxu0 %v1157_v54 }
  0x39   :  { %1056 = vmatprep.subr.bf16.mxu0 %v1158_v56  ;;  %1077 = vmatpush3.bf16.msra.mxu1 %v1185_v8 }
  0x3a   :  { %1078 = vmatprep.subr.bf16.mxu1 %v1187_v10 }
  0x3c   :  { %1057 = vmatpush3.bf16.msra.mxu0 %v1159_v58 }
  0x3d   :  { %1058 = vmatprep.subr.bf16.mxu0 %v1160_v60  ;;  %1079 = vmatpush3.bf16.msra.mxu1 %v1189_v12 }
  0x3e   :  { %1080 = vmatprep.subr.bf16.mxu1 %v1191_v15 }
  0x40   :  { %1059 = vmatpush3.bf16.msra.mxu0 %v1161_v62 }
  0x41   :  { %1088 = vmatprep.subr.bf16.mxu0 %v1166_v0  ;;  %1081 = vmatpush3.bf16.msra.mxu1 %v1193_v17 }
  0x43   :  { %541 = vmatmul.mubr.bf16.vlgmr.msra.gmra.mrb[4].mxu0 %v914_v2 }
  0x44   :  { %1089 = vmatpush3.bf16.msra.mxu0 %v1168_v3  ;;  %854 = vmatmul.mubr.bf16.vlgmr.msra.gmra.mrb[4].mxu1 %v964_v19 }
  0x45   :  { %1090 = vmatprep.subr.bf16.mxu0 %v1170_v5  ;;  %893 = vmatprep.mubr.bf16.mxu0 %v967_v23 }
  0x48   :  { %1091 = vmatpush3.bf16.msra.mxu0 %v1172_v7 }
  0x49   :  { %1092 = vmatprep.subr.bf16.mxu0 %v1174_v9 }
  0x4c   :  { %1093 = vmatpush3.bf16.msra.mxu0 %v1176_v11 }
  0x4d   :  { %1094 = vmatprep.subr.bf16.mxu0 %v1178_v13 }
  0x50   :  { %1095 = vmatpush3.bf16.msra.mxu0 %v1180_v14 }
  0x51   :  { %1096 = vmatprep.subr.bf16.mxu0 %v1182_v16 }
  0x54   :  { %1097 = vmatpush3.bf16.msra.mxu0 %v1184_v22 }
  0x55   :  { %1098 = vmatprep.subr.bf16.mxu0 %v1186_v24 }
  0x58   :  { %1099 = vmatpush3.bf16.msra.mxu0 %v1188_v25 }
  0x59   :  { %1100 = vmatprep.subr.bf16.mxu0 %v1190_v26 }
  0x5c   :  { %1101 = vmatpush3.bf16.msra.mxu0 %v1192_v27 }
  0x5d   :  { %1102 = vmatprep.subr.bf16.mxu0 %v1196_v28 }
  0x60   :  { %1103 = vmatpush3.bf16.msra.mxu0 %v1197_v29 }
  0x63   :  { %894 = vmatmul.mubr.bf16.vlgmr.msra.gmra.mrb[8].mxu0 %v966_v30 }
  0xf6   :  { %v1016_v31 = vpop.f32.mrb[0].mxu0 }
  0xf7   :  { %v1038_v32 = vpop.f32.mrb[0].mxu1  ;;  %v1017_v33 = vpop.f32.mrb[1].mxu0 }
  0xf8   :  { %v1039_v34 = vpop.f32.mrb[1].mxu1  ;;  %v1018_v35 = vadd.f32 %v1017_v33, %v1016_v31  ;;  %v1019_v37 = vpop.f32.mrb[2].mxu0 }
  0xf9   :  { %v1040_v36 = vadd.f32 %v1039_v34, %v1038_v32  ;;  %v1041_v38 = vpop.f32.mrb[2].mxu1  ;;  %v1020_v39 = vpop.f32.mrb[3].mxu0 }
  0xfa   :  { %v1042_v40 = vpop.f32.mrb[3].mxu1 }
  0xfb   :  { %v503_v41 = vadd.f32 %v1040_v36, %v1018_v35 }
 0x116   :  { %v1060_v42 = vpop.f32.mrb[4].mxu0 }
 0x117   :  { %v1061_v43 = vpop.f32.mrb[5].mxu0  ;;  %v1082_v48 = vpop.f32.mrb[4].mxu1 }
 0x118   :  { %v1062_v44 = vadd.f32 %v1061_v43, %v1060_v42  ;;  %v1063_v45 = vpop.f32.mrb[6].mxu0  ;;  %v1083_v49 = vpop.f32.mrb[5].mxu1 }
 0x119   :  { %v1064_v46 = vpop.f32.mrb[7].mxu0  ;;  %v1084_v50 = vadd.f32 %v1083_v49, %v1082_v48  ;;  %v1085_v51 = vpop.f32.mrb[6].mxu1 }
 0x11a   :  { %v543_v47 = vadd.f32 %v1062_v44, %v503_v41  ;;  %v1086_v52 = vpop.f32.mrb[7].mxu1 }
 0x11c   :  { %548 = vst [vmem:[%s1495_s4] sm:$0xff] %v543_v47 }
 0x136   :  { %v1104_v53 = vpop.f32.mrb[8].mxu0 }
 0x137   :  { %v1105_v54 = vpop.f32.mrb[9].mxu0 }
 0x138   :  { %v1106_v55 = vadd.f32 %v1105_v54, %v1104_v53  ;;  %v1107_v56 = vpop.f32.mrb[10].mxu0 }
 0x139   :  { %v1108_v57 = vpop.f32.mrb[11].mxu0 }
 0x13a   :  { %v896_v58 = vadd.f32 %v1106_v55, %v1084_v50 }
 0x13c   :  { %901 = vst [vmem:[%s1496_s5] sm:$0xff] %v896_v58 }

// kernel: clip_adapter_head.2
= control target key start
LH: loop header
LB: loop body
LE: loop exit
PB: predicated region body
PF: predicated region fallthrough
CT: control target
= control target key end

     0   :  { %18 = vsyncpa [#allocation5], 0  ;;  %s2846_s0 = inlined_call_operand.<no memory space> [shape: s32[1], index: 0, kind: input, shape index: {}]   ;;  %s2847_s1 = inlined_call_operand.vmem [shape: f32[8,768], index: 1, kind: input, shape index: {}]   ;;  %s2848_s2 = inlined_call_operand.vmem [shape: f32[8,512], index: 2, kind: input, shape index: {}]   ;;  %s2849_s3 = inlined_call_operand.hbm [shape: bf16[768,256], index: 3, kind: input, shape index: {}]   ;;  %s2850_s4 = inlined_call_operand.hbm [shape: bf16[256,768], index: 4, kind: input, shape index: {}]   ;;  %s2851_s5 = inlined_call_operand.vmem [shape: f32[1,768], index: 5, kind: input, shape index: {}]   ;;  %s2852_s6 = inlined_call_operand.vmem [shape: f32[1,768], index: 6, kind: input, shape index: {}]   ;;  %s2853_s7 = inlined_call_operand.vmem [shape: f32[1,512], index: 7, kind: input, shape index: {}]   ;;  %s2854_s8 = inlined_call_operand.vmem [shape: f32[1,512], index: 8, kind: input, shape index: {}]   ;;  %s2855_s9 = inlined_call_operand.vmem [shape: bf16[8,768], index: 9, kind: output, shape index: {0}]   ;;  %s2856_s10 = inlined_call_operand.vmem [shape: bf16[8,512], index: 10, kind: output, shape index: {1}]   ;;  %s2857_s11 = inlined_call_operand.vmem [shape: f32[8,1280], index: 11, kind: output, shape index: {2}]  }
   0x1   :  { %19 = vsyncpa [#allocation7], 0  ;;  %s2504_s17 = smov [#allocation4]   ;;  %s2456_s21 = scalar_lea.hbm %s2849_s3, 12288 }
   0x2   :  { %s29_s18 = sshll.u32 %s2504_s17, 4  ;;  %p2457_p0 = scmp.ne.s32.totalorder %s2849_s3, %s2456_s21  ;;  %s30_s18 = int_to_ptr.vmem [resolvable:$true] %s29_s18 }
   0x3   :  { %p2460_p1 = scmp.lt.u32.totalorder %s2456_s21, %s2849_s3 }
   0x5   :  { %p2462_p2 = pnand %p2460_p1, %p2457_p0 }
   0x7   :  { %2465 = shalt.err (!%p2462_p2)
}
   0x8   :  { %s2466_s26 = scalar_lea.vmem %s30_s18, 12288  ;;  %p2471_p4 = scmp.lt.s32.totalorder %s30_s18, %s30_s18 }
   0x9   :  { %p2467_p3 = scmp.ne.s32.totalorder %s30_s18, %s2466_s26  ;;  %p2472_p5 = scmp.lt.s32.totalorder %s2466_s26, %s2466_s26 }
   0xb   :  { %p2473_p6 = por %p2472_p5, %p2471_p4 }
   0xd   :  { %p2474_p7 = pnand %p2473_p6, %p2467_p3 }
   0xf   :  { %2477 = shalt.err (!%p2474_p7)
}
  0x10   :  { %s2505_s27 = smov 128   ;;  %s2506_s28 = smov 8  }
  0x11   :  { %35 = dma.hbm_to_vmem [thread:$0]  %s2849_s3, 12288, %s30_s18, [#allocation5], %s2505_s27, %s2505_s27, %s2506_s28  }
  0x12   :  { %s2507_s12 = smov [#allocation6]   ;;  %s2478_s16 = scalar_lea.hbm %s2850_s4, 12288 }
  0x13   :  { %s41_s13 = sshll.u32 %s2507_s12, 4  ;;  %p2479_p8 = scmp.ne.s32.totalorder %s2850_s4, %s2478_s16  ;;  %s42_s13 = int_to_ptr.vmem [resolvable:$true] %s41_s13 }
  0x14   :  { %p2482_p9 = scmp.lt.u32.totalorder %s2478_s16, %s2850_s4 }
  0x16   :  { %p2484_p10 = pnand %p2482_p9, %p2479_p8 }
  0x18   :  { %2487 = shalt.err (!%p2484_p10)
}
  0x19   :  { %s2488_s22 = scalar_lea.vmem %s42_s13, 12288  ;;  %p2493_p12 = scmp.lt.s32.totalorder %s42_s13, %s42_s13 }
  0x1a   :  { %p2489_p11 = scmp.ne.s32.totalorder %s42_s13, %s2488_s22  ;;  %p2494_p13 = scmp.lt.s32.totalorder %s2488_s22, %s2488_s22 }
  0x1c   :  { %p2495_p0 = por %p2494_p13, %p2493_p12 }
  0x1e   :  { %p2496_p1 = pnand %p2495_p0, %p2489_p11 }
  0x20   :  { %2499 = shalt.err (!%p2496_p1)
}
  0x21   :  { %s2508_s3 = smov 384   ;;  %s2509_s18 = smov 24  }
  0x22   :  { %47 = dma.hbm_to_vmem [thread:$0]  %s2850_s4, 12288, %s42_s13, [#allocation7], %s2508_s3, %s2508_s3, %s2509_s18  }
  0x23   :  { %2500 = dma.done.wait [#allocation5], 12288  }
  0x24   :  { %2501 = vsyncadd [#allocation5], 4294955008 }
  0x25   :  { %2502 = dma.done.wait [#allocation7], 12288  }
  0x26   :  { %2503 = vsyncadd [#allocation7], 4294955008  ;;  %v2143_v0 = vld [vmem:[#allocation4 + $0x4] ss:$8 sps:$4 sm:$0xff]   ;;  %v2145_v1 = vld [vmem:[#allocation4] ss:$8 sps:$4 sm:$0xff]   ;;  %s1511_s20 = scvt.s32.f32 %s2846_s0 }
  0x27   :  { %654 = vmatprep.subr.bf16.mxu0 %v2143_v0  ;;  %v2146_v2 = vld [vmem:[#allocation4 + $0x14] ss:$8 sps:$4 sm:$0xff]   ;;  %v2148_v3 = vld [vmem:[#allocation4 + $0x10] ss:$8 sps:$4 sm:$0xff]   ;;  %v2149_v4 = vld [vmem:[#allocation4 + $0x24] ss:$8 sps:$4 sm:$0xff]  }
  0x28   :  { %655 = vmatpush1.bf16.msra.mxu0 %v2145_v1  ;;  %v2151_v5 = vld [vmem:[#allocation4 + $0x20] ss:$8 sps:$4 sm:$0xff]   ;;  %v2152_v6 = vld [vmem:[#allocation4 + $0x34] ss:$8 sps:$4 sm:$0xff]   ;;  %v2154_v7 = vld [vmem:[#allocation4 + $0x30] ss:$8 sps:$4 sm:$0xff]  }
  0x29   :  { %656 = vmatprep.subr.bf16.mxu0 %v2146_v2  ;;  %v2155_v8 = vld [vmem:[#allocation4 + $0x44] ss:$8 sps:$4 sm:$0xff]   ;;  %v2157_v9 = vld [vmem:[#allocation4 + $0x40] ss:$8 sps:$4 sm:$0xff]   ;;  %v2158_v10 = vld [vmem:[#allocation4 + $0x54] ss:$8 sps:$4 sm:$0xff]  }
  0x2a   :  { %v2160_v11 = vld [vmem:[#allocation4 + $0x50] ss:$8 sps:$4 sm:$0xff]   ;;  %v2161_v12 = vld [vmem:[#allocation4 + $0x64] ss:$8 sps:$4 sm:$0xff]   ;;  %v2163_v15 = vld [vmem:[#allocation4 + $0x60] ss:$8 sps:$4 sm:$0xff]  }
  0x2b   :  { %v63_v13 = vld [vmem:[%s2847_s1 + $0x8] sm:$0xff]  ;;  %v2164_v16 = vld [vmem:[#allocation4 + $0x74] ss:$8 sps:$4 sm:$0xff]   ;;  %v2166_v17 = vld [vmem:[#allocation4 + $0x70] ss:$8 sps:$4 sm:$0xff]  }
  0x2c   :  { %657 = vmatpush1.bf16.msra.mxu0 %v2148_v3  ;;  %v73_v14 = vpack.c.bf16 %v63_v13, %v63_v13  ;;  %v2167_v18 = vld [vmem:[#allocation4 + $0x84] ss:$8 sps:$4 sm:$0xff]   ;;  %v2169_v19 = vld [vmem:[#allocation4 + $0x80] ss:$8 sps:$4 sm:$0xff]   ;;  %v2170_v20 = vld [vmem:[#allocation4 + $0x94] ss:$8 sps:$4 sm:$0xff]  }
  0x2d   :  { %658 = vmatprep.subr.bf16.mxu0 %v2149_v4  ;;  %v2172_v21 = vld [vmem:[#allocation4 + $0x90] ss:$8 sps:$4 sm:$0xff]   ;;  %v2173_v22 = vld [vmem:[#allocation4 + $0xa4] ss:$8 sps:$4 sm:$0xff]   ;;  %v2175_v23 = vld [vmem:[#allocation4 + $0xa0] ss:$8 sps:$4 sm:$0xff]  }
  0x2e   :  { %686 = vmatprep.mubr.bf16.mxu0 %v73_v14  ;;  %v2176_v24 = vld [vmem:[#allocation4 + $0xb4] ss:$8 sps:$4 sm:$0xff]   ;;  %v2178_v25 = vld [vmem:[#allocation4 + $0xb0] ss:$8 sps:$4 sm:$0xff]   ;;  %v2179_v26 = vld [vmem:[#allocation4 + $0xc4] ss:$8 sps:$4 sm:$0xff]  }
  0x2f   :  { %v2181_v27 = vld [vmem:[#allocation4 + $0xc0] ss:$8 sps:$4 sm:$0xff]   ;;  %v2182_v28 = vld [vmem:[#allocation4 + $0xd4] ss:$8 sps:$4 sm:$0xff]   ;;  %v2184_v29 = vld [vmem:[#allocation4 + $0xd0] ss:$8 sps:$4 sm:$0xff]  }
  0x30   :  { %659 = vmatpush1.bf16.msra.mxu0 %v2151_v5  ;;  %v2185_v30 = vld [vmem:[#allocation4 + $0xe4] ss:$8 sps:$4 sm:$0xff]   ;;  %v2187_v31 = vld [vmem:[#allocation4 + $0xe0] ss:$8 sps:$4 sm:$0xff]   ;;  %v2188_v32 = vld [vmem:[#allocation4 + $0xf4] ss:$8 sps:$4 sm:$0xff]  }
  0x31   :  { %660 = vmatprep.subr.bf16.mxu0 %v2152_v6  ;;  %v2190_v33 = vld [vmem:[#allocation4 + $0xf0] ss:$8 sps:$4 sm:$0xff]   ;;  %v2193_v34 = vld [vmem:[#allocation4 + $0x104] ss:$8 sps:$4 sm:$0xff]   ;;  %v2191_v38 = vld [vmem:[#allocation4 + $0x100] ss:$8 sps:$4 sm:$0xff]  }
  0x32   :  { %v62_v35 = vld [vmem:[%s2847_s1] sm:$0xff]  ;;  %v65_v36 = vld [vmem:[%s2847_s1 + $0x18] sm:$0xff]  ;;  %v2290_v45 = vld [vmem:[#allocation6 + $0x34] ss:$24 sps:$4 sm:$0xff]  }
  0x33   :  { %v72_v37 = vpack.c.bf16 %v62_v35, %v62_v35  ;;  %v75_v39 = vpack.c.bf16 %v65_v36, %v65_v36  ;;  %v2196_v40 = vld [vmem:[#allocation4 + $0x114] ss:$8 sps:$4 sm:$0xff]   ;;  %v2194_v41 = vld [vmem:[#allocation4 + $0x110] ss:$8 sps:$4 sm:$0xff]   ;;  %v2199_v44 = vld [vmem:[#allocation4 + $0x124] ss:$8 sps:$4 sm:$0xff]  }
  0x34   :  { %661 = vmatpush1.bf16.msra.mxu0 %v2154_v7  ;;  %v2287_v42 = vld [vmem:[#allocation6 + $0x4] ss:$24 sps:$4 sm:$0xff]   ;;  %v2289_v43 = vld [vmem:[#allocation6] ss:$24 sps:$4 sm:$0xff]   ;;  %v2292_v46 = vld [vmem:[#allocation6 + $0x30] ss:$24 sps:$4 sm:$0xff]  }
  0x35   :  { %662 = vmatprep.subr.bf16.mxu0 %v2155_v8  ;;  %1357 = vmatprep.subr.bf16.mxu1 %v2287_v42  ;;  %v2293_v47 = vld [vmem:[#allocation6 + $0x64] ss:$24 sps:$4 sm:$0xff]   ;;  %v2197_v48 = vld [vmem:[#allocation4 + $0x120] ss:$8 sps:$4 sm:$0xff]   ;;  %v2296_v51 = vld [vmem:[#allocation6 + $0x94] ss:$24 sps:$4 sm:$0xff]  }
  0x36   :  { %1358 = vmatpush1.bf16.msra.mxu1 %v2289_v43  ;;  %v2202_v49 = vld [vmem:[#allocation4 + $0x134] ss:$8 sps:$4 sm:$0xff]   ;;  %v2295_v50 = vld [vmem:[#allocation6 + $0x60] ss:$24 sps:$4 sm:$0xff]   ;;  %v2205_v53 = vld [vmem:[#allocation4 + $0x144] ss:$8 sps:$4 sm:$0xff]  }
  0x37   :  { %1359 = vmatprep.subr.bf16.mxu1 %v2290_v45  ;;  %v2200_v52 = vld [vmem:[#allocation4 + $0x130] ss:$8 sps:$4 sm:$0xff]   ;;  %v2299_v55 = vld [vmem:[#allocation6 + $0xc4] ss:$24 sps:$4 sm:$0xff]   ;;  %v2203_v56 = vld [vmem:[#allocation4 + $0x140] ss:$8 sps:$4 sm:$0xff]  }
  0x38   :  { %663 = vmatpush1.bf16.msra.mxu0 %v2157_v9  ;;  %v2298_v54 = vld [vmem:[#allocation6 + $0x90] ss:$24 sps:$4 sm:$0xff]   ;;  %v2208_v57 = vld [vmem:[#allocation4 + $0x154] ss:$8 sps:$4 sm:$0xff]   ;;  %v2301_v58 = vld [vmem:[#allocation6 + $0xc0] ss:$24 sps:$4 sm:$0xff]  }
  0x39   :  { %664 = vmatprep.subr.bf16.mxu0 %v2158_v10  ;;  %v2302_v59 = vld [vmem:[#allocation6 + $0xf4] ss:$24 sps:$4 sm:$0xff]   ;;  %v2206_v60 = vld [vmem:[#allocation4 + $0x150] ss:$8 sps:$4 sm:$0xff]   ;;  %v2209_v62 = vld [vmem:[#allocation4 + $0x160] ss:$8 sps:$4 sm:$0xff]  }
  0x3a   :  { %1360 = vmatpush1.bf16.msra.mxu1 %v2292_v46  ;;  %v2211_v61 = vld [vmem:[#allocation4 + $0x164] ss:$8 sps:$4 sm:$0xff]   ;;  %v2304_v63 = vld [vmem:[#allocation6 + $0xf0] ss:$24 sps:$4 sm:$0xff]   ;;  %v2214_v1 = vld [vmem:[#allocation4 + $0x174] ss:$8 sps:$4 sm:$0xff]  }
  0x3b   :  { %1361 = vmatprep.subr.bf16.mxu1 %v2293_v47  ;;  %v2305_v0 = vld [vmem:[#allocation6 + $0x124] ss:$24 sps:$4 sm:$0xff]   ;;  %v2307_v2 = vld [vmem:[#allocation6 + $0x120] ss:$24 sps:$4 sm:$0xff]   ;;  %v2308_v3 = vld [vmem:[#allocation6 + $0x154] ss:$24 sps:$4 sm:$0xff]  }
  0x3c   :  { %665 = vmatpush1.bf16.msra.mxu0 %v2160_v11  ;;  %v2212_v4 = vld [vmem:[#allocation4 + $0x170] ss:$8 sps:$4 sm:$0xff]   ;;  %v2217_v5 = vld [vmem:[#allocation4 + $0x184] ss:$8 sps:$4 sm:$0xff]   ;;  %v2215_v8 = vld [vmem:[#allocation4 + $0x180] ss:$8 sps:$4 sm:$0xff]  }
  0x3d   :  { %666 = vmatprep.subr.bf16.mxu0 %v2161_v12  ;;  %v2310_v6 = vld [vmem:[#allocation6 + $0x150] ss:$24 sps:$4 sm:$0xff]   ;;  %v2311_v7 = vld [vmem:[#allocation6 + $0x184] ss:$24 sps:$4 sm:$0xff]   ;;  %v2313_v10 = vld [vmem:[#allocation6 + $0x180] ss:$24 sps:$4 sm:$0xff]  }
  0x3e   :  { %1362 = vmatpush1.bf16.msra.mxu1 %v2295_v50  ;;  %v2220_v9 = vld [vmem:[#allocation4 + $0x194] ss:$8 sps:$4 sm:$0xff]   ;;  %v2218_v12 = vld [vmem:[#allocation4 + $0x190] ss:$8 sps:$4 sm:$0xff]   ;;  %v2223_v13 = vld [vmem:[#allocation4 + $0x1a4] ss:$8 sps:$4 sm:$0xff]  }
  0x3f   :  { %1363 = vmatprep.subr.bf16.mxu1 %v2296_v51  ;;  %v2314_v11 = vld [vmem:[#allocation6 + $0x1b4] ss:$24 sps:$4 sm:$0xff]   ;;  %v2316_v14 = vld [vmem:[#allocation6 + $0x1b0] ss:$24 sps:$4 sm:$0xff]  }
  0x40   :  { %667 = vmatpush1.bf16.msra.mxu0 %v2163_v15  ;;  %v2317_v15 = vld [vmem:[#allocation6 + $0x1e4] ss:$24 sps:$4 sm:$0xff]   ;;  %v2236_v35 = vld [vmem:[#allocation4 + $0x1f0] ss:$8 sps:$4 sm:$0xff]   ;;  %v2245_v45 = vld [vmem:[#allocation4 + $0x220] ss:$8 sps:$4 sm:$0xff]  }
  0x41   :  { %668 = vmatprep.subr.bf16.mxu0 %v2164_v16  ;;  %v2221_v16 = vld [vmem:[#allocation4 + $0x1a0] ss:$8 sps:$4 sm:$0xff]   ;;  %v2607_v36 = vld [vmem:[%s2847_s1 + $0x10] sm:$0xff] }
  0x42   :  { %1364 = vmatpush1.bf16.msra.mxu1 %v2298_v54  ;;  %v2244_v42 = vld [vmem:[#allocation4 + $0x214] ss:$8 sps:$4 sm:$0xff]   ;;  %v2242_v43 = vld [vmem:[#allocation4 + $0x210] ss:$8 sps:$4 sm:$0xff]  }
  0x43   :  { %1365 = vmatprep.subr.bf16.mxu1 %v2299_v55  ;;  %v2250_v46 = vld [vmem:[#allocation4 + $0x234] ss:$8 sps:$4 sm:$0xff]   ;;  %v2248_v47 = vld [vmem:[#allocation4 + $0x230] ss:$8 sps:$4 sm:$0xff]  }
  0x44   :  { %669 = vmatpush1.bf16.msra.mxu0 %v2166_v17  ;;  %v2226_v17 = vld [vmem:[#allocation4 + $0x1b4] ss:$8 sps:$4 sm:$0xff]   ;;  %v2254_v51 = vld [vmem:[#allocation4 + $0x250] ss:$8 sps:$4 sm:$0xff]  }
  0x45   :  { %670 = vmatprep.subr.bf16.mxu0 %v2167_v18  ;;  %v2319_v18 = vld [vmem:[#allocation6 + $0x1e0] ss:$24 sps:$4 sm:$0xff]   ;;  %v2256_v50 = vld [vmem:[#allocation4 + $0x254] ss:$8 sps:$4 sm:$0xff]  }
  0x46   :  { %1366 = vmatpush1.bf16.msra.mxu1 %v2301_v58  ;;  %v2262_v54 = vld [vmem:[#allocation4 + $0x274] ss:$8 sps:$4 sm:$0xff]   ;;  %v2260_v55 = vld [vmem:[#allocation4 + $0x270] ss:$8 sps:$4 sm:$0xff]  }
  0x47   :  { %1367 = vmatprep.subr.bf16.mxu1 %v2302_v59  ;;  %v2268_v58 = vld [vmem:[#allocation4 + $0x294] ss:$8 sps:$4 sm:$0xff]   ;;  %v2266_v59 = vld [vmem:[#allocation4 + $0x290] ss:$8 sps:$4 sm:$0xff]  }
  0x48   :  { %671 = vmatpush1.bf16.msra.mxu0 %v2169_v19  ;;  %v2320_v19 = vld [vmem:[#allocation6 + $0x214] ss:$24 sps:$4 sm:$0xff]  }
  0x49   :  { %672 = vmatprep.subr.bf16.mxu0 %v2170_v20  ;;  %v2224_v20 = vld [vmem:[#allocation4 + $0x1b0] ss:$8 sps:$4 sm:$0xff]  }
  0x4a   :  { %1368 = vmatpush1.bf16.msra.mxu1 %v2304_v63  ;;  %v2272_v63 = vld [vmem:[#allocation4 + $0x2b0] ss:$8 sps:$4 sm:$0xff]  }
  0x4b   :  { %1369 = vmatprep.subr.bf16.mxu1 %v2305_v0  ;;  %v2277_v0 = vld [vmem:[#allocation4 + $0x2c4] ss:$8 sps:$4 sm:$0xff]  }
  0x4c   :  { %673 = vmatpush1.bf16.msra.mxu0 %v2172_v21  ;;  %v2229_v21 = vld [vmem:[#allocation4 + $0x1c4] ss:$8 sps:$4 sm:$0xff]  }
  0x4d   :  { %674 = vmatprep.subr.bf16.mxu0 %v2173_v22  ;;  %v2322_v22 = vld [vmem:[#allocation6 + $0x210] ss:$24 sps:$4 sm:$0xff]  }
  0x4e   :  { %1370 = vmatpush1.bf16.msra.mxu1 %v2307_v2  ;;  %v2280_v2 = vld [vmem:[#allocation4 + $0x2d4] ss:$8 sps:$4 sm:$0xff]  }
  0x4f   :  { %1371 = vmatprep.subr.bf16.mxu1 %v2308_v3  ;;  %v2278_v3 = vld [vmem:[#allocation4 + $0x2d0] ss:$8 sps:$4 sm:$0xff]  }
  0x50   :  { %675 = vmatpush1.bf16.msra.mxu0 %v2175_v23  ;;  %v2323_v23 = vld [vmem:[#allocation6 + $0x244] ss:$24 sps:$4 sm:$0xff]  }
  0x51   :  { %676 = vmatprep.subr.bf16.mxu0 %v2176_v24  ;;  %v2227_v24 = vld [vmem:[#allocation4 + $0x1c0] ss:$8 sps:$4 sm:$0xff]  }
  0x52   :  { %1372 = vmatpush1.bf16.msra.mxu1 %v2310_v6  ;;  %v2286_v6 = vld [vmem:[#allocation4 + $0x2f4] ss:$8 sps:$4 sm:$0xff]  }
  0x53   :  { %1373 = vmatprep.subr.bf16.mxu1 %v2311_v7  ;;  %v2284_v7 = vld [vmem:[#allocation4 + $0x2f0] ss:$8 sps:$4 sm:$0xff]  }
  0x54   :  { %677 = vmatpush1.bf16.msra.mxu0 %v2178_v25  ;;  %v2232_v25 = vld [vmem:[#allocation4 + $0x1d4] ss:$8 sps:$4 sm:$0xff]  }
  0x55   :  { %678 = vmatprep.subr.bf16.mxu0 %v2179_v26  ;;  %v2325_v26 = vld [vmem:[#allocation6 + $0x240] ss:$24 sps:$4 sm:$0xff]  }
  0x56   :  { %1374 = vmatpush1.bf16.msra.mxu1 %v2313_v10  ;;  %v2332_v10 = vld [vmem:[#allocation6 + $0x2d4] ss:$24 sps:$4 sm:$0xff]  }
  0x57   :  { %1375 = vmatprep.subr.bf16.mxu1 %v2314_v11  ;;  %v2334_v11 = vld [vmem:[#allocation6 + $0x2d0] ss:$24 sps:$4 sm:$0xff]  }
  0x58   :  { %679 = vmatpush1.bf16.msra.mxu0 %v2181_v27  ;;  %v2326_v27 = vld [vmem:[#allocation6 + $0x274] ss:$24 sps:$4 sm:$0xff]  }
  0x59   :  { %680 = vmatprep.subr.bf16.mxu0 %v2182_v28  ;;  %v2230_v28 = vld [vmem:[#allocation4 + $0x1d0] ss:$8 sps:$4 sm:$0xff]  }
  0x5a   :  { %1376 = vmatpush1.bf16.msra.mxu1 %v2316_v14 }
  0x5b   :  { %1377 = vmatprep.subr.bf16.mxu1 %v2317_v15 }
  0x5c   :  { %681 = vmatpush1.bf16.msra.mxu0 %v2184_v29  ;;  %v2235_v29 = vld [vmem:[#allocation4 + $0x1e4] ss:$8 sps:$4 sm:$0xff]  }
  0x5d   :  { %682 = vmatprep.subr.bf16.mxu0 %v2185_v30  ;;  %v2328_v30 = vld [vmem:[#allocation6 + $0x270] ss:$24 sps:$4 sm:$0xff]  }
  0x5e   :  { %1378 = vmatpush1.bf16.msra.mxu1 %v2319_v18 }
  0x5f   :  { %1379 = vmatprep.subr.bf16.mxu1 %v2320_v19 }
  0x60   :  { %683 = vmatpush1.bf16.msra.mxu0 %v2187_v31  ;;  %v2329_v31 = vld [vmem:[#allocation6 + $0x2a4] ss:$24 sps:$4 sm:$0xff]  }
  0x61   :  { %684 = vmatprep.subr.bf16.mxu0 %v2188_v32  ;;  %v2233_v32 = vld [vmem:[#allocation4 + $0x1e0] ss:$8 sps:$4 sm:$0xff]  }
  0x62   :  { %1380 = vmatpush1.bf16.msra.mxu1 %v2322_v22  ;;  %v2340_v22 = vld [vmem:[#allocation6 + $0x3c] ss:$24 sps:$4 sm:$0xff]  }
  0x63   :  { %1381 = vmatprep.subr.bf16.mxu1 %v2323_v23  ;;  %v2338_v23 = vld [vmem:[#allocation6 + $0x38] ss:$24 sps:$4 sm:$0xff]  }
  0x64   :  { %685 = vmatpush1.bf16.msra.mxu0 %v2190_v33  ;;  %v2238_v33 = vld [vmem:[#allocation4 + $0x1f4] ss:$8 sps:$4 sm:$0xff]  }
  0x65   :  { %695 = vmatprep.subr.bf16.mxu0 %v2193_v34  ;;  %v2331_v34 = vld [vmem:[#allocation6 + $0x2a0] ss:$24 sps:$4 sm:$0xff]  }
  0x66   :  { %1382 = vmatpush1.bf16.msra.mxu1 %v2325_v26  ;;  %v2341_v26 = vld [vmem:[#allocation6 + $0x68] ss:$24 sps:$4 sm:$0xff]  }
  0x67   :  { %687 = vmatmul.mubr.bf16.vlgmr.msra.gmra.mrb[0].mxu0 %v72_v37  ;;  %1383 = vmatprep.subr.bf16.mxu1 %v2326_v27  ;;  %v2241_v37 = vld [vmem:[#allocation4 + $0x204] ss:$8 sps:$4 sm:$0xff]   ;;  %v2346_v27 = vld [vmem:[#allocation6 + $0x9c] ss:$24 sps:$4 sm:$0xff]  }
  0x68   :  { %696 = vmatpush1.bf16.msra.mxu0 %v2191_v38  ;;  %727 = vmatprep.mubr.bf16.mxu0 %v75_v39  ;;  %v2612_v38 = vld [vmem:[%s2847_s1 + $0x28] sm:$0xff]  ;;  %v74_v39 = vpack.c.bf16 %v2607_v36, %v2607_v36 }
  0x69   :  { %697 = vmatprep.subr.bf16.mxu0 %v2196_v40  ;;  %v2239_v40 = vld [vmem:[#allocation4 + $0x200] ss:$8 sps:$4 sm:$0xff]  }
  0x6a   :  { %1384 = vmatpush1.bf16.msra.mxu1 %v2328_v30 }
  0x6b   :  { %1385 = vmatprep.subr.bf16.mxu1 %v2329_v31  ;;  %v2347_v31 = vld [vmem:[#allocation6 + $0xc8] ss:$24 sps:$4 sm:$0xff]  }
  0x6c   :  { %698 = vmatpush1.bf16.msra.mxu0 %v2194_v41  ;;  %v77_v41 = vpack.c.bf16 %v2612_v38, %v2612_v38 }
  0x6d   :  { %699 = vmatprep.subr.bf16.mxu0 %v2199_v44  ;;  %v2247_v44 = vld [vmem:[#allocation4 + $0x224] ss:$8 sps:$4 sm:$0xff]  }
  0x6e   :  { %1386 = vmatpush1.bf16.msra.mxu1 %v2331_v34  ;;  %v2355_v34 = vld [vmem:[#allocation6 + $0x12c] ss:$24 sps:$4 sm:$0xff]  }
  0x6f   :  { %1387 = vmatprep.subr.bf16.mxu1 %v2332_v10  ;;  %v2407_v10 = vld [vmem:[#allocation6 + $0x190] ss:$24 sps:$4 sm:$0xff]  }
  0x70   :  { %700 = vmatpush1.bf16.msra.mxu0 %v2197_v48  ;;  %v2253_v48 = vld [vmem:[#allocation4 + $0x244] ss:$8 sps:$4 sm:$0xff]  }
  0x71   :  { %701 = vmatprep.subr.bf16.mxu0 %v2202_v49  ;;  %v2251_v49 = vld [vmem:[#allocation4 + $0x240] ss:$8 sps:$4 sm:$0xff]  }
  0x72   :  { %1388 = vmatpush1.bf16.msra.mxu1 %v2334_v11  ;;  %v2412_v11 = vld [vmem:[#allocation6 + $0x1c4] ss:$24 sps:$4 sm:$0xff]  }
  0x74   :  { %702 = vmatpush1.bf16.msra.mxu0 %v2200_v52  ;;  %v2259_v52 = vld [vmem:[#allocation4 + $0x264] ss:$8 sps:$4 sm:$0xff]  }
  0x75   :  { %703 = vmatprep.subr.bf16.mxu0 %v2205_v53  ;;  %v2257_v53 = vld [vmem:[#allocation4 + $0x260] ss:$8 sps:$4 sm:$0xff]  }
  0x78   :  { %704 = vmatpush1.bf16.msra.mxu0 %v2203_v56  ;;  %v2265_v56 = vld [vmem:[#allocation4 + $0x284] ss:$8 sps:$4 sm:$0xff]  }
  0x79   :  { %705 = vmatprep.subr.bf16.mxu0 %v2208_v57  ;;  %v2263_v57 = vld [vmem:[#allocation4 + $0x280] ss:$8 sps:$4 sm:$0xff]  }
  0x7c   :  { %706 = vmatpush1.bf16.msra.mxu0 %v2206_v60  ;;  %v2271_v60 = vld [vmem:[#allocation4 + $0x2a4] ss:$8 sps:$4 sm:$0xff]  }
  0x7d   :  { %707 = vmatprep.subr.bf16.mxu0 %v2211_v61  ;;  %v2269_v61 = vld [vmem:[#allocation4 + $0x2a0] ss:$8 sps:$4 sm:$0xff]  }
  0x80   :  { %708 = vmatpush1.bf16.msra.mxu0 %v2209_v62  ;;  %v2274_v62 = vld [vmem:[#allocation4 + $0x2b4] ss:$8 sps:$4 sm:$0xff]  }
  0x81   :  { %709 = vmatprep.subr.bf16.mxu0 %v2214_v1  ;;  %v2275_v1 = vld [vmem:[#allocation4 + $0x2c0] ss:$8 sps:$4 sm:$0xff]  }
  0x84   :  { %710 = vmatpush1.bf16.msra.mxu0 %v2212_v4  ;;  %v2283_v4 = vld [vmem:[#allocation4 + $0x2e4] ss:$8 sps:$4 sm:$0xff]  }
  0x85   :  { %711 = vmatprep.subr.bf16.mxu0 %v2217_v5  ;;  %v2281_v5 = vld [vmem:[#allocation4 + $0x2e0] ss:$8 sps:$4 sm:$0xff]  }
  0x88   :  { %712 = vmatpush1.bf16.msra.mxu0 %v2215_v8  ;;  %v2621_v8 = vld [vmem:[%s2847_s1 + $0x20] sm:$0xff] }
  0x89   :  { %713 = vmatprep.subr.bf16.mxu0 %v2220_v9  ;;  %v76_v9 = vpack.c.bf16 %v2621_v8, %v2621_v8 }
  0x8c   :  { %714 = vmatpush1.bf16.msra.mxu0 %v2218_v12  ;;  %v2337_v12 = vld [vmem:[#allocation6 + $0xc] ss:$24 sps:$4 sm:$0xff]  }
  0x8d   :  { %715 = vmatprep.subr.bf16.mxu0 %v2223_v13  ;;  %1398 = vmatprep.subr.bf16.mxu1 %v2337_v12  ;;  %v2410_v12 = vld [vmem:[#allocation6 + $0x1c0] ss:$24 sps:$4 sm:$0xff]  }
  0x90   :  { %716 = vmatpush1.bf16.msra.mxu0 %v2221_v16 }
  0x91   :  { %717 = vmatprep.subr.bf16.mxu0 %v2226_v17 }
  0x94   :  { %718 = vmatpush1.bf16.msra.mxu0 %v2224_v20  ;;  %v2335_v20 = vld [vmem:[#allocation6 + $0x8] ss:$24 sps:$4 sm:$0xff]  }
  0x95   :  { %719 = vmatprep.subr.bf16.mxu0 %v2229_v21 }
  0x98   :  { %720 = vmatpush1.bf16.msra.mxu0 %v2227_v24  ;;  %v2343_v24 = vld [vmem:[#allocation6 + $0x6c] ss:$24 sps:$4 sm:$0xff]  }
  0x99   :  { %721 = vmatprep.subr.bf16.mxu0 %v2232_v25  ;;  %v1512_v25 = vstv %s1511_s20 }
  0x9a   :  { %2431 = vrcp.f32 %v1512_v25  ;;  %v2427_v25 = vld [vmem:[#allocation6 + $0x2b4] ss:$24 sps:$4 sm:$0xff]  }
  0x9c   :  { %722 = vmatpush1.bf16.msra.mxu0 %v2230_v28  ;;  %v2344_v28 = vld [vmem:[#allocation6 + $0x98] ss:$24 sps:$4 sm:$0xff]  }
  0x9d   :  { %723 = vmatprep.subr.bf16.mxu0 %v2235_v29  ;;  %v2349_v29 = vld [vmem:[#allocation6 + $0xcc] ss:$24 sps:$4 sm:$0xff]  }
  0xa0   :  { %724 = vmatpush1.bf16.msra.mxu0 %v2233_v32  ;;  %v2352_v32 = vld [vmem:[#allocation6 + $0xfc] ss:$24 sps:$4 sm:$0xff]  }
  0xa1   :  { %725 = vmatprep.subr.bf16.mxu0 %v2238_v33  ;;  %v2350_v33 = vld [vmem:[#allocation6 + $0xf8] ss:$24 sps:$4 sm:$0xff]  }
  0xa4   :  { %726 = vmatpush1.bf16.msra.mxu0 %v2236_v35  ;;  %v2432_v30 = vpop.eup %2431  ;;  %v2353_v35 = vld [vmem:[#allocation6 + $0x128] ss:$24 sps:$4 sm:$0xff]  }
  0xa5   :  { %736 = vmatprep.subr.bf16.mxu0 %v2241_v37  ;;  %2134 = vpush %v2432_v30  ;;  %v2358_v37 = vld [vmem:[#allocation6 + $0x15c] ss:$24 sps:$4 sm:$0xff]  }
  0xa7   :  { %728 = vmatmul.mubr.bf16.vlgmr.msra.gmra.mrb[0].mxu0 %v74_v39  ;;  %v2356_v39 = vld [vmem:[#allocation6 + $0x158] ss:$24 sps:$4 sm:$0xff]  }
  0xa8   :  { %737 = vmatpush1.bf16.msra.mxu0 %v2239_v40  ;;  %768 = vmatprep.mubr.bf16.mxu0 %v77_v41  ;;  %v2361_v40 = vld [vmem:[#allocation6 + $0x18c] ss:$24 sps:$4 sm:$0xff]   ;;  %v2359_v41 = vld [vmem:[#allocation6 + $0x188] ss:$24 sps:$4 sm:$0xff]  }
  0xa9   :  { %738 = vmatprep.subr.bf16.mxu0 %v2244_v42  ;;  %v2364_v42 = vld [vmem:[#allocation6 + $0x1bc] ss:$24 sps:$4 sm:$0xff]  }
  0xac   :  { %739 = vmatpush1.bf16.msra.mxu0 %v2242_v43  ;;  %v2362_v43 = vld [vmem:[#allocation6 + $0x1b8] ss:$24 sps:$4 sm:$0xff]  }
  0xad   :  { %740 = vmatprep.subr.bf16.mxu0 %v2247_v44  ;;  %v2367_v44 = vld [vmem:[#allocation6 + $0x1ec] ss:$24 sps:$4 sm:$0xff]  }
  0xb0   :  { %741 = vmatpush1.bf16.msra.mxu0 %v2245_v45  ;;  %v2365_v45 = vld [vmem:[#allocation6 + $0x1e8] ss:$24 sps:$4 sm:$0xff]  }
  0xb1   :  { %742 = vmatprep.subr.bf16.mxu0 %v2250_v46  ;;  %v2370_v46 = vld [vmem:[#allocation6 + $0x21c] ss:$24 sps:$4 sm:$0xff]  }
  0xb4   :  { %743 = vmatpush1.bf16.msra.mxu0 %v2248_v47  ;;  %v2368_v47 = vld [vmem:[#allocation6 + $0x218] ss:$24 sps:$4 sm:$0xff]  }
  0xb5   :  { %744 = vmatprep.subr.bf16.mxu0 %v2253_v48  ;;  %v2373_v48 = vld [vmem:[#allocation6 + $0x24c] ss:$24 sps:$4 sm:$0xff]  }
  0xb8   :  { %745 = vmatpush1.bf16.msra.mxu0 %v2251_v49  ;;  %v2371_v49 = vld [vmem:[#allocation6 + $0x248] ss:$24 sps:$4 sm:$0xff]  }
  0xb9   :  { %746 = vmatprep.subr.bf16.mxu0 %v2256_v50  ;;  %v2376_v50 = vld [vmem:[#allocation6 + $0x27c] ss:$24 sps:$4 sm:$0xff]  }
  0xbc   :  { %747 = vmatpush1.bf16.msra.mxu0 %v2254_v51  ;;  %v2374_v51 = vld [vmem:[#allocation6 + $0x278] ss:$24 sps:$4 sm:$0xff]  }
  0xbd   :  { %748 = vmatprep.subr.bf16.mxu0 %v2259_v52  ;;  %v2379_v52 = vld [vmem:[#allocation6 + $0x2ac] ss:$24 sps:$4 sm:$0xff]  }
  0xc0   :  { %749 = vmatpush1.bf16.msra.mxu0 %v2257_v53  ;;  %v2377_v53 = vld [vmem:[#allocation6 + $0x2a8] ss:$24 sps:$4 sm:$0xff]  }
  0xc1   :  { %750 = vmatprep.subr.bf16.mxu0 %v2262_v54  ;;  %v2382_v54 = vld [vmem:[#allocation6 + $0x2dc] ss:$24 sps:$4 sm:$0xff]  }
  0xc4   :  { %751 = vmatpush1.bf16.msra.mxu0 %v2260_v55  ;;  %v2380_v55 = vld [vmem:[#allocation6 + $0x2d8] ss:$24 sps:$4 sm:$0xff]  }
  0xc5   :  { %752 = vmatprep.subr.bf16.mxu0 %v2265_v56  ;;  %v2385_v56 = vld [vmem:[#allocation6 + $0x14] ss:$24 sps:$4 sm:$0xff]  }
  0xc8   :  { %753 = vmatpush1.bf16.msra.mxu0 %v2263_v57  ;;  %v2383_v57 = vld [vmem:[#allocation6 + $0x10] ss:$24 sps:$4 sm:$0xff]  }
  0xc9   :  { %754 = vmatprep.subr.bf16.mxu0 %v2268_v58  ;;  %v2388_v58 = vld [vmem:[#allocation6 + $0x44] ss:$24 sps:$4 sm:$0xff]  }
  0xcc   :  { %755 = vmatpush1.bf16.msra.mxu0 %v2266_v59  ;;  %v2386_v59 = vld [vmem:[#allocation6 + $0x40] ss:$24 sps:$4 sm:$0xff]  }
  0xcd   :  { %756 = vmatprep.subr.bf16.mxu0 %v2271_v60  ;;  %v2391_v60 = vld [vmem:[#allocation6 + $0x74] ss:$24 sps:$4 sm:$0xff]  }
  0xd0   :  { %757 = vmatpush1.bf16.msra.mxu0 %v2269_v61  ;;  %v2389_v61 = vld [vmem:[#allocation6 + $0x70] ss:$24 sps:$4 sm:$0xff]  }
  0xd1   :  { %758 = vmatprep.subr.bf16.mxu0 %v2274_v62  ;;  %v2394_v62 = vld [vmem:[#allocation6 + $0xa4] ss:$24 sps:$4 sm:$0xff]  }
  0xd4   :  { %759 = vmatpush1.bf16.msra.mxu0 %v2272_v63  ;;  %v2392_v63 = vld [vmem:[#allocation6 + $0xa0] ss:$24 sps:$4 sm:$0xff]  }
  0xd5   :  { %760 = vmatprep.subr.bf16.mxu0 %v2277_v0  ;;  %v2397_v0 = vld [vmem:[#allocation6 + $0xd4] ss:$24 sps:$4 sm:$0xff]  }
  0xd8   :  { %761 = vmatpush1.bf16.msra.mxu0 %v2275_v1  ;;  %v2395_v1 = vld [vmem:[#allocation6 + $0xd0] ss:$24 sps:$4 sm:$0xff]  }
  0xd9   :  { %762 = vmatprep.subr.bf16.mxu0 %v2280_v2  ;;  %v2400_v2 = vld [vmem:[#allocation6 + $0x104] ss:$24 sps:$4 sm:$0xff]  }
  0xdc   :  { %763 = vmatpush1.bf16.msra.mxu0 %v2278_v3  ;;  %v2398_v3 = vld [vmem:[#allocation6 + $0x100] ss:$24 sps:$4 sm:$0xff]  }
  0xdd   :  { %764 = vmatprep.subr.bf16.mxu0 %v2283_v4  ;;  %v2403_v4 = vld [vmem:[#allocation6 + $0x134] ss:$24 sps:$4 sm:$0xff]  }
  0xe0   :  { %765 = vmatpush1.bf16.msra.mxu0 %v2281_v5  ;;  %v2401_v5 = vld [vmem:[#allocation6 + $0x130] ss:$24 sps:$4 sm:$0xff]  }
  0xe1   :  { %766 = vmatprep.subr.bf16.mxu0 %v2286_v6  ;;  %v2406_v6 = vld [vmem:[#allocation6 + $0x164] ss:$24 sps:$4 sm:$0xff]  }
  0xe4   :  { %767 = vmatpush1.bf16.msra.mxu0 %v2284_v7  ;;  %v2404_v7 = vld [vmem:[#allocation6 + $0x160] ss:$24 sps:$4 sm:$0xff]  }
  0xe7   :  { %769 = vmatmul.mubr.bf16.vlgmr.msra.gmra.mrb[0].mxu0 %v76_v9  ;;  %v2409_v9 = vld [vmem:[#allocation6 + $0x194] ss:$24 sps:$4 sm:$0xff]  }
 0x1ba   :  { %v770_v13 = vpop.f32.mrb[0].mxu0 }
 0x1bb   :  { %v777_v14 = vmax.f32 %v770_v13, 0.0  ;;  %v772_v15 = vpop.f32.mrb[1].mxu0  ;;  %v2415_v13 = vld [vmem:[#allocation6 + $0x1f4] ss:$24 sps:$4 sm:$0xff]  }
 0x1bc   :  { %v778_v16 = vmax.f32 %v772_v15, 0.0  ;;  %v774_v17 = vpop.f32.mrb[2].mxu0  ;;  %v2418_v15 = vld [vmem:[#allocation6 + $0x224] ss:$24 sps:$4 sm:$0xff]  }
 0x1bd   :  { %v775_v18 = vpop.f32.mrb[3].mxu0  ;;  %v2627_v21 = vpack.c.bf16 %v777_v14, %v777_v14  ;;  %v2413_v14 = vld [vmem:[#allocation6 + $0x1f0] ss:$24 sps:$4 sm:$0xff]  }
 0x1be   :  { %v2625_v19 = vpack.c.bf16 %v778_v16, %v778_v16  ;;  %v2640_v16 = vld [vmem:[%s2848_s2] sm:$0xff]  ;;  %v2645_v17 = vld [vmem:[%s2848_s2 + $0x8] sm:$0xff]  ;;  %v2650_v18 = vld [vmem:[%s2848_s2 + $0x10] sm:$0xff] }
 0x1bf   :  { %1905 = vst [vmem:[%s2857_s11 + $0x30] sm:$0xff] %v2640_v16  ;;  %1906 = vst [vmem:[%s2857_s11 + $0x38] sm:$0xff] %v2645_v17 }
 0x1c0   :  { %1389 = vmatprep.mubr.bf16.mxu1 %v2625_v19  ;;  %1907 = vst [vmem:[%s2857_s11 + $0x40] sm:$0xff] %v2650_v18 }
 0x1c1   :  { %1390 = vmatmul.mubr.bf16.vlgmr.msra.gmra.mrb[0].mxu1 %v2627_v21 }
 0x1c2   :  { %1399 = vmatpush1.bf16.msra.mxu1 %v2335_v20  ;;  %1430 = vmatprep.mubr.bf16.mxu1 %v2625_v19  ;;  %v2421_v20 = vld [vmem:[#allocation6 + $0x254] ss:$24 sps:$4 sm:$0xff]  }
 0x1c3   :  { %1400 = vmatprep.subr.bf16.mxu1 %v2340_v22  ;;  %v2419_v22 = vld [vmem:[#allocation6 + $0x250] ss:$24 sps:$4 sm:$0xff]  }
 0x1c6   :  { %1401 = vmatpush1.bf16.msra.mxu1 %v2338_v23  ;;  %v2424_v23 = vld [vmem:[#allocation6 + $0x284] ss:$24 sps:$4 sm:$0xff]  }
 0x1c7   :  { %1402 = vmatprep.subr.bf16.mxu1 %v2343_v24  ;;  %v2422_v24 = vld [vmem:[#allocation6 + $0x280] ss:$24 sps:$4 sm:$0xff]  }
 0x1ca   :  { %1403 = vmatpush1.bf16.msra.mxu1 %v2341_v26  ;;  %v2425_v26 = vld [vmem:[#allocation6 + $0x2b0] ss:$24 sps:$4 sm:$0xff]  }
 0x1cb   :  { %1404 = vmatprep.subr.bf16.mxu1 %v2346_v27  ;;  %v2430_v27 = vld [vmem:[#allocation6 + $0x2e4] ss:$24 sps:$4 sm:$0xff]  }
 0x1ce   :  { %1405 = vmatpush1.bf16.msra.mxu1 %v2344_v28  ;;  %v2428_v28 = vld [vmem:[#allocation6 + $0x2e0] ss:$24 sps:$4 sm:$0xff]  }
 0x1cf   :  { %1406 = vmatprep.subr.bf16.mxu1 %v2349_v29  ;;  %v1505_v29 = vlaneseq }
 0x1d1   :  { %v2665_v30 = vshrl.u32 %v1505_v29, 7 }
 0x1d2   :  { %1407 = vmatpush1.bf16.msra.mxu1 %v2347_v31  ;;  %v1507_v31 = vstv %s2846_s0 }
 0x1d3   :  { %1408 = vmatprep.subr.bf16.mxu1 %v2352_v32  ;;  %vm1508_vm0 = vcmp.lt.s32.totalorder %v2665_v30, %v1507_v31  ;;  %v2510_v32 = vmov 0.0  }
 0x1d6   :  { %1409 = vmatpush1.bf16.msra.mxu1 %v2350_v33  ;;  %v2671_v33 = vsel %vm1508_vm0, 1.0, %v2510_v32 }
 0x1d7   :  { %1410 = vmatprep.subr.bf16.mxu1 %v2355_v34  ;;  %v71_v34 = vld [vmem:[%s2848_s2 + $0x18] sm:$0xff]  ;;  %s2135_s2 = spop %2134 }
 0x1d8   :  { %1908 = vst [vmem:[%s2857_s11 + $0x48] sm:$0xff] %v71_v34 }
 0x1da   :  { %1411 = vmatpush1.bf16.msra.mxu1 %v2353_v35  ;;  %v1718_v35 = vmul.f32 %v2671_v33, %v2640_v16 }
 0x1db   :  { %1412 = vmatprep.subr.bf16.mxu1 %v2358_v37  ;;  %v1720_v37 = vmul.f32 %v2671_v33, %v2650_v18 }
 0x1de   :  { %1413 = vmatpush1.bf16.msra.mxu1 %v2356_v39  ;;  %v1721_v39 = vmul.f32 %v2671_v33, %v71_v34 }
 0x1df   :  { %1414 = vmatprep.subr.bf16.mxu1 %v2361_v40  ;;  %v1722_v40 = vrot.slane %v1718_v35, 4 }
 0x1e2   :  { %1415 = vmatpush1.bf16.msra.mxu1 %v2359_v41 }
 0x1e3   :  { %1416 = vmatprep.subr.bf16.mxu1 %v2364_v42  ;;  %v1734_v42 = vrot.slane %v1720_v37, 4 }
 0x1e6   :  { %1417 = vmatpush1.bf16.msra.mxu1 %v2362_v43  ;;  %v1740_v43 = vrot.slane %v1721_v39, 4 }
 0x1e7   :  { %1418 = vmatprep.subr.bf16.mxu1 %v2367_v44  ;;  %v1723_v44 = vadd.f32 %v1722_v40, %v1718_v35 }
 0x1ea   :  { %1419 = vmatpush1.bf16.msra.mxu1 %v2365_v45 }
 0x1eb   :  { %1420 = vmatprep.subr.bf16.mxu1 %v2370_v46  ;;  %v1735_v46 = vadd.f32 %v1734_v42, %v1720_v37 }
 0x1ee   :  { %1421 = vmatpush1.bf16.msra.mxu1 %v2368_v47  ;;  %v1741_v47 = vadd.f32 %v1740_v43, %v1721_v39 }
 0x1ef   :  { %1422 = vmatprep.subr.bf16.mxu1 %v2373_v48  ;;  %v1724_v48 = vrot.slane %v1723_v44, 2 }
 0x1f2   :  { %1423 = vmatpush1.bf16.msra.mxu1 %v2371_v49 }
 0x1f3   :  { %1424 = vmatprep.subr.bf16.mxu1 %v2376_v50  ;;  %v1736_v50 = vrot.slane %v1735_v46, 2 }
 0x1f6   :  { %1425 = vmatpush1.bf16.msra.mxu1 %v2374_v51  ;;  %v1742_v51 = vrot.slane %v1741_v47, 2 }
 0x1f7   :  { %1426 = vmatprep.subr.bf16.mxu1 %v2379_v52  ;;  %v1725_v52 = vadd.f32 %v1724_v48, %v1723_v44 }
 0x1fa   :  { %1427 = vmatpush1.bf16.msra.mxu1 %v2377_v53 }
 0x1fb   :  { %1428 = vmatprep.subr.bf16.mxu1 %v2382_v54  ;;  %v1737_v54 = vadd.f32 %v1736_v50, %v1735_v46 }
 0x1fe   :  { %1429 = vmatpush1.bf16.msra.mxu1 %v2380_v55  ;;  %v1743_v55 = vadd.f32 %v1742_v51, %v1741_v47 }
 0x1ff   :  { %1439 = vmatprep.subr.bf16.mxu1 %v2385_v56  ;;  %v1726_v56 = vrot.slane %v1725_v52, 1 }
 0x201   :  { %1431 = vmatmul.mubr.bf16.vlgmr.msra.gmra.mrb[4].mxu1 %v2627_v21 }
 0x202   :  { %1440 = vmatpush1.bf16.msra.mxu1 %v2383_v57  ;;  %1471 = vmatprep.mubr.bf16.mxu1 %v2625_v19  ;;  %v2416_v19 = vld [vmem:[#allocation6 + $0x220] ss:$24 sps:$4 sm:$0xff]  }
 0x203   :  { %1441 = vmatprep.subr.bf16.mxu1 %v2388_v58  ;;  %v1738_v58 = vrot.slane %v1737_v54, 1 }
 0x206   :  { %1442 = vmatpush1.bf16.msra.mxu1 %v2386_v59  ;;  %v1744_v59 = vrot.slane %v1743_v55, 1 }
 0x207   :  { %1443 = vmatprep.subr.bf16.mxu1 %v2391_v60  ;;  %v1727_v60 = vadd.f32 %v1726_v56, %v1725_v52 }
 0x20a   :  { %1444 = vmatpush1.bf16.msra.mxu1 %v2389_v61 }
 0x20b   :  { %1445 = vmatprep.subr.bf16.mxu1 %v2394_v62  ;;  %v1739_v62 = vadd.f32 %v1738_v58, %v1737_v54 }
 0x20e   :  { %1446 = vmatpush1.bf16.msra.mxu1 %v2392_v63  ;;  %v1745_v63 = vadd.f32 %v1744_v59, %v1743_v55 }
 0x20f   :  { %1447 = vmatprep.subr.bf16.mxu1 %v2397_v0  ;;  %v2686_v0 = vstv %s2135_s2 }
 0x212   :  { %1448 = vmatpush1.bf16.msra.mxu1 %v2395_v1  ;;  %v1746_v1 = vmul.f32 %v1727_v60, %v2686_v0 }
 0x213   :  { %1449 = vmatprep.subr.bf16.mxu1 %v2400_v2 }
 0x216   :  { %1450 = vmatpush1.bf16.msra.mxu1 %v2398_v3  ;;  %v1748_v3 = vmul.f32 %v1739_v62, %v2686_v0 }
 0x217   :  { %1451 = vmatprep.subr.bf16.mxu1 %v2403_v4  ;;  %v1749_v4 = vmul.f32 %v1745_v63, %v2686_v0 }
 0x21a   :  { %1452 = vmatpush1.bf16.msra.mxu1 %v2401_v5  ;;  %v2693_v5 = vsub.f32 %v2640_v16, %v1746_v1 }
 0x21b   :  { %1453 = vmatprep.subr.bf16.mxu1 %v2406_v6 }
 0x21e   :  { %1454 = vmatpush1.bf16.msra.mxu1 %v2404_v7  ;;  %v2699_v7 = vsub.f32 %v2650_v18, %v1748_v3 }
 0x21f   :  { %1455 = vmatprep.subr.bf16.mxu1 %v2409_v9  ;;  %v1754_v9 = vmul.f32 %v2671_v33, %v2693_v5 }
 0x222   :  { %1456 = vmatpush1.bf16.msra.mxu1 %v2407_v10 }
 0x223   :  { %1457 = vmatprep.subr.bf16.mxu1 %v2412_v11  ;;  %v1756_v11 = vmul.f32 %v2671_v33, %v2699_v7 }
 0x226   :  { %1458 = vmatpush1.bf16.msra.mxu1 %v2410_v12  ;;  %v2707_v12 = vsub.f32 %v71_v34, %v1749_v4 }
 0x227   :  { %1459 = vmatprep.subr.bf16.mxu1 %v2415_v13  ;;  %v1758_v13 = vmul.f32 %v1754_v9, %v1754_v9 }
 0x22a   :  { %1460 = vmatpush1.bf16.msra.mxu1 %v2413_v14 }
 0x22b   :  { %1461 = vmatprep.subr.bf16.mxu1 %v2418_v15  ;;  %v1760_v15 = vmul.f32 %v1756_v11, %v1756_v11 }
 0x22e   :  { %1462 = vmatpush1.bf16.msra.mxu1 %v2416_v19  ;;  %v1757_v19 = vmul.f32 %v2671_v33, %v2707_v12 }
 0x22f   :  { %1463 = vmatprep.subr.bf16.mxu1 %v2421_v20 }
 0x230   :  { %v1761_v31 = vmul.f32 %v1757_v19, %v1757_v19 }
 0x232   :  { %1464 = vmatpush1.bf16.msra.mxu1 %v2419_v22  ;;  %v1780_v40 = vrot.slane %v1761_v31, 4 }
 0x233   :  { %1465 = vmatprep.subr.bf16.mxu1 %v2424_v23  ;;  %v1762_v23 = vrot.slane %v1758_v13, 4 }
 0x234   :  { %v1781_v46 = vadd.f32 %v1780_v40, %v1761_v31 }
 0x235   :  { %v1763_v35 = vadd.f32 %v1762_v23, %v1758_v13  ;;  %v2733_v23 = vsub.s32 0, %v2665_v30 }
 0x236   :  { %1466 = vmatpush1.bf16.msra.mxu1 %v2422_v24  ;;  %v1782_v52 = vrot.slane %v1781_v46, 2 }
 0x237   :  { %1467 = vmatprep.subr.bf16.mxu1 %v2427_v25  ;;  %v1774_v25 = vrot.slane %v1760_v15, 4  ;;  %v1764_v42 = vrot.slane %v1763_v35, 2 }
 0x238   :  { %v1783_v58 = vadd.f32 %v1782_v52, %v1781_v46 }
 0x239   :  { %v1775_v37 = vadd.f32 %v1774_v25, %v1760_v15  ;;  %v1765_v48 = vadd.f32 %v1764_v42, %v1763_v35 }
 0x23a   :  { %1468 = vmatpush1.bf16.msra.mxu1 %v2425_v26  ;;  %v2454_v26 = vld [vmem:[%s2847_s1 + $0x8] sm:$0xff]  ;;  %v1784_v1 = vrot.slane %v1783_v58, 1 }
 0x23b   :  { %1469 = vmatprep.subr.bf16.mxu1 %v2430_v27  ;;  %v1493_v27 = vmul.f32 0.8, %v2454_v26  ;;  %v1776_v44 = vrot.slane %v1775_v37, 2  ;;  %v1766_v54 = vrot.slane %v1765_v48, 1  ;;  %v2736_v26 = vsub.s32 1, %v2665_v30 }
 0x23c   :  { %v1785_v11 = vadd.f32 %v1784_v1, %v1783_v58 }
 0x23d   :  { %v1777_v50 = vadd.f32 %v1776_v44, %v1775_v37  ;;  %v1767_v60 = vadd.f32 %v1766_v54, %v1765_v48 }
 0x23e   :  { %1470 = vmatpush1.bf16.msra.mxu1 %v2428_v28 }
 0x23f   :  { %v1778_v56 = vrot.slane %v1777_v50, 1  ;;  %v1786_v3 = vmul.f32 %v1767_v60, %v2686_v0 }
 0x241   :  { %1472 = vmatmul.mubr.bf16.vlgmr.msra.gmra.mrb[8].mxu1 %v2627_v21  ;;  %v1719_v21 = vmul.f32 %v2671_v33, %v2645_v17  ;;  %v1779_v62 = vadd.f32 %v1778_v56, %v1777_v50 }
 0x243   :  { %v1728_v41 = vrot.slane %v1719_v21, 4  ;;  %v1788_v9 = vmul.f32 %v1779_v62, %v2686_v0 }
 0x245   :  { %v1729_v45 = vadd.f32 %v1728_v41, %v1719_v21 }
 0x247   :  { %v1730_v49 = vrot.slane %v1729_v45, 2 }
 0x249   :  { %v1731_v53 = vadd.f32 %v1730_v49, %v1729_v45 }
 0x24b   :  { %v1732_v57 = vrot.slane %v1731_v53, 1 }
 0x24d   :  { %v1733_v61 = vadd.f32 %v1732_v57, %v1731_v53 }
 0x24f   :  { %v1747_v2 = vmul.f32 %v1733_v61, %v2686_v0 }
 0x251   :  { %v2696_v6 = vsub.f32 %v2645_v17, %v1747_v2  ;;  %v2453_v17 = vld [vmem:[%s2847_s1] sm:$0xff] }
 0x252   :  { %v1492_v18 = vmul.f32 0.8, %v2453_v17 }
 0x253   :  { %v1755_v10 = vmul.f32 %v2671_v33, %v2696_v6 }
 0x255   :  { %v1759_v14 = vmul.f32 %v1755_v10, %v1755_v10 }
 0x257   :  { %v1768_v24 = vrot.slane %v1759_v14, 4 }
 0x259   :  { %v1769_v21 = vadd.f32 %v1768_v24, %v1759_v14  ;;  %v1816_v14 = vadd.f32 1e-05, %v1786_v3 }
 0x25b   :  { %v1770_v43 = vrot.slane %v1769_v21, 2  ;;  %2433 = vrsqrt.f32 %v1816_v14 }
 0x25d   :  { %v1771_v49 = vadd.f32 %v1770_v43, %v1769_v21 }
 0x25f   :  { %v1772_v55 = vrot.slane %v1771_v49, 1 }
 0x261   :  { %v1773_v61 = vadd.f32 %v1772_v55, %v1771_v49 }
 0x263   :  { %v1787_v4 = vmul.f32 %v1773_v61, %v2686_v0 }
 0x265   :  { %v1817_v15 = vadd.f32 1e-05, %v1787_v4 }
 0x267   :  { %2435 = vrsqrt.f32 %v1817_v15 }
 0x294   :  { %v1391_v16 = vpop.f32.mrb[0].mxu1 }
 0x295   :  { %v1480_v20 = vmax.f32 %v1391_v16, 0.0  ;;  %v1393_v22 = vpop.f32.mrb[1].mxu1  ;;  %v1818_v16 = vadd.f32 1e-05, %v1788_v9 }
 0x296   :  { %v1481_v28 = vmax.f32 %v1393_v22, 0.0  ;;  %v1395_v29 = vpop.f32.mrb[2].mxu1 }
 0x297   :  { %v1486_v32 = vmul.f32 0.2, %v1480_v20  ;;  %v1396_v34 = vpop.f32.mrb[3].mxu1  ;;  %v1790_v20 = vld [vmem:[%s2853_s7] sm:$0xf]  ;;  %2437 = vrsqrt.f32 %v1818_v16 }
 0x298   :  { %v1487_v39 = vmul.f32 0.2, %v1481_v28  ;;  %v2739_v28 = vsub.s32 2, %v2665_v30  ;;  %v1795_v29 = vrot.slane %v1790_v20, %v2733_v23  ;;  %v2745_v34 = vsub.s32 3, %v2665_v30 }
 0x299   :  { %v1498_v41 = vadd.f32 %v1492_v18, %v1486_v32  ;;  %v1789_v18 = vmul.f32 %v1785_v11, %v2686_v0  ;;  %v1799_v32 = vrot.slane %v1790_v20, %v2736_v26 }
 0x29a   :  { %v1499_v45 = vadd.f32 %v1493_v27, %v1487_v39  ;;  %v1803_v21 = vrot.slane %v1790_v20, %v2739_v28  ;;  %v1828_v39 = vld [vmem:[%s2854_s8] sm:$0xf]  ;;  %v1807_v40 = vrot.slane %v1790_v20, %v2745_v34  ;;  %v1812_v43 = vmul.f32 %v1795_v29, %v2693_v5 }
 0x29b   :  { %v1515_v47 = vmul.f32 %v2671_v33, %v1498_v41  ;;  %1899 = vst [vmem:[%s2857_s11] sm:$0xff] %v1498_v41  ;;  %v1819_v24 = vadd.f32 1e-05, %v1789_v18  ;;  %v1813_v46 = vmul.f32 %v1799_v32, %v2696_v6  ;;  %v1833_v49 = vrot.slane %v1828_v39, %v2733_v23  ;;  %v2783_v29 = vld [vmem:[%s2852_s6] sm:$0x3f] }
 0x29c   :  { %v1516_v51 = vmul.f32 %v2671_v33, %v1499_v45  ;;  %1900 = vst [vmem:[%s2857_s11 + $0x8] sm:$0xff] %v1499_v45  ;;  %v1814_v48 = vmul.f32 %v1803_v21, %v2699_v7  ;;  %v1815_v52 = vmul.f32 %v1807_v40, %v2707_v12  ;;  %v1841_v5 = vrot.slane %v1828_v39, %v2739_v28 }
 0x29d   :  { %v1521_v53 = vrot.slane %v1515_v47, 4  ;;  %2439 = vrsqrt.f32 %v1819_v24  ;;  %v2774_v24 = vld [vmem:[%s2851_s5] sm:$0x3f]  ;;  %v1685_v32 = vrot.slane %v2783_v29, %v2733_v23 }
 0x29e   :  { %v1527_v57 = vrot.slane %v1516_v51, 4 }
 0x29f   :  { %v1522_v59 = vadd.f32 %v1521_v53, %v1515_v47 }
 0x2a0   :  { %v1528_v63 = vadd.f32 %v1527_v57, %v1516_v51  ;;  %v1837_v51 = vrot.slane %v1828_v39, %v2736_v26  ;;  %v1845_v57 = vrot.slane %v1828_v39, %v2745_v34  ;;  %v1689_v39 = vrot.slane %v2783_v29, %v2736_v26 }
 0x2a1   :  { %v1523_v2 = vrot.slane %v1522_v59, 2 }
 0x2a2   :  { %v1529_v10 = vrot.slane %v1528_v63, 2 }
 0x2a3   :  { %v1524_v13 = vadd.f32 %v1523_v2, %v1522_v59 }
 0x2a4   :  { %v1530_v17 = vadd.f32 %v1529_v10, %v1528_v63 }
 0x2a5   :  { %v1525_v19 = vrot.slane %v1524_v13, 1 }
 0x2a6   :  { %v1531_v22 = vrot.slane %v1530_v17, 1 }
 0x2a7   :  { %v1526_v25 = vadd.f32 %v1525_v19, %v1524_v13 }
 0x2a8   :  { %v1532_v27 = vadd.f32 %v1531_v22, %v1530_v17 }
 0x2a9   :  { %v1558_v31 = vmul.f32 %v2686_v0, %v1526_v25  ;;  %v1629_v25 = vrot.slane %v2774_v24, %v2733_v23 }
 0x2aa   :  { %v1559_v35 = vmul.f32 %v2686_v0, %v1532_v27  ;;  %v1633_v27 = vrot.slane %v2774_v24, %v2736_v26  ;;  %v2455_v26 = vld [vmem:[%s2847_s1 + $0x18] sm:$0xff] }
 0x2ab   :  { %v1564_v37 = vsub.f32 %v1498_v41, %v1558_v31  ;;  %v2434_v41 = vpop.eup %2433 }
 0x2ac   :  { %v1565_v42 = vsub.f32 %v1499_v45, %v1559_v35  ;;  %v2436_v53 = vpop.eup %2435  ;;  %v1824_v54 = vmul.f32 %v2434_v41, %v1812_v43  ;;  %v1494_v41 = vmul.f32 0.8, %v2607_v36 }
 0x2ad   :  { %v1570_v44 = vmul.f32 %v2671_v33, %v1564_v37  ;;  %v2438_v55 = vpop.eup %2437  ;;  %v1825_v6 = vmul.f32 %v2436_v53, %v1813_v46  ;;  %v1656_v31 = vmul.f32 %v1629_v25, %v1564_v37 }
 0x2ae   :  { %v1571_v47 = vmul.f32 %v2671_v33, %v1565_v42  ;;  %v2440_v58 = vpop.eup %2439  ;;  %v1826_v59 = vmul.f32 %v2438_v55, %v1814_v48  ;;  %v1850_v60 = vadd.f32 %v1833_v49, %v1824_v54  ;;  %v1657_v21 = vmul.f32 %v1633_v27, %v1565_v42 }
 0x2af   :  { %v1576_v50 = vmul.f32 %v1570_v44, %v1570_v44  ;;  %v1851_v62 = vadd.f32 %v1837_v51, %v1825_v6  ;;  %v1827_v63 = vmul.f32 %v2440_v58, %v1815_v52  ;;  %v1495_v42 = vmul.f32 0.8, %v2455_v26 }
 0x2b0   :  { %v1577_v45 = vmul.f32 %v1571_v47, %v1571_v47  ;;  %v1852_v2 = vadd.f32 %v1841_v5, %v1826_v59 }
 0x2b1   :  { %v1582_v56 = vrot.slane %v1576_v50, 4  ;;  %v2124_v3 = vpack.c.bf16 %v1851_v62, %v1850_v60  ;;  %v1853_v4 = vadd.f32 %v1845_v57, %v1827_v63 }
 0x2b2   :  { %v1588_v7 = vrot.slane %v1577_v45, 4 }
 0x2b3   :  { %v1583_v61 = vadd.f32 %v1582_v56, %v1576_v50  ;;  %1897 = vst [vmem:[%s2856_s10] sm:$0xff] %v2124_v3  ;;  %v2125_v11 = vpack.c.bf16 %v1853_v4, %v1852_v2  ;;  %v1637_v3 = vrot.slane %v2774_v24, %v2739_v28 }
 0x2b4   :  { %v1589_v1 = vadd.f32 %v1588_v7, %v1577_v45 }
 0x2b5   :  { %v1584_v12 = vrot.slane %v1583_v61, 2  ;;  %1898 = vst [vmem:[%s2856_s10 + $0x8] sm:$0xff] %v2125_v11 }
 0x2b6   :  { %v1590_v9 = vrot.slane %v1589_v1, 2 }
 0x2b7   :  { %v1585_v10 = vadd.f32 %v1584_v12, %v1583_v61 }
 0x2b8   :  { %v1591_v13 = vadd.f32 %v1590_v9, %v1589_v1  ;;  %v1641_v9 = vrot.slane %v2774_v24, %v2745_v34 }
 0x2b9   :  { %v1586_v14 = vrot.slane %v1585_v10, 1 }
 0x2ba   :  { %v1592_v15 = vrot.slane %v1591_v13, 1 }
 0x2bb   :  { %v1587_v16 = vadd.f32 %v1586_v14, %v1585_v10 }
 0x2bc   :  { %v1593_v17 = vadd.f32 %v1592_v15, %v1591_v13 }
 0x2bd   :  { %v1618_v18 = vmul.f32 %v1587_v16, %v2686_v0 }
 0x2be   :  { %v1619_v19 = vmul.f32 %v1593_v17, %v2686_v0 }
 0x2bf   :  { %v1662_v20 = vadd.f32 1e-05, %v1618_v18 }
 0x2c0   :  { %v1663_v22 = vadd.f32 1e-05, %v1619_v19 }
 0x2c1   :  { %2441 = vrsqrt.f32 %v1662_v20 }
 0x2c2   :  { %2443 = vrsqrt.f32 %v1663_v22 }
 0x2cb   :  { %v2442_v35 = vpop.eup %2441 }
 0x2cc   :  { %v2444_v40 = vpop.eup %2443  ;;  %v1674_v43 = vmul.f32 %v2442_v35, %v1656_v31 }
 0x2cd   :  { %v1675_v44 = vmul.f32 %v2444_v40, %v1657_v21 }
 0x2ce   :  { %v1712_v46 = vadd.f32 %v1685_v32, %v1674_v43 }
 0x2cf   :  { %v1713_v47 = vadd.f32 %v1689_v39, %v1675_v44 }
 0x2d1   :  { %v2121_v48 = vpack.c.bf16 %v1713_v47, %v1712_v46 }
 0x2d3   :  { %1878 = vst [vmem:[%s2855_s9] sm:$0xff] %v2121_v48 }
 0x2d4   :  { %v1432_v49 = vpop.f32.mrb[4].mxu1 }
 0x2d5   :  { %v1482_v37 = vmax.f32 %v1432_v49, 0.0  ;;  %v1434_v23 = vpop.f32.mrb[5].mxu1  ;;  %v1693_v49 = vrot.slane %v2783_v29, %v2739_v28 }
 0x2d6   :  { %v1483_v50 = vmax.f32 %v1434_v23, 0.0  ;;  %v1436_v51 = vpop.f32.mrb[6].mxu1 }
 0x2d7   :  { %v1488_v52 = vmul.f32 0.2, %v1482_v37  ;;  %v1437_v53 = vpop.f32.mrb[7].mxu1 }
 0x2d8   :  { %v1489_v45 = vmul.f32 0.2, %v1483_v50 }
 0x2d9   :  { %v1500_v54 = vadd.f32 %v1494_v41, %v1488_v52  ;;  %v1697_v41 = vrot.slane %v2783_v29, %v2745_v34 }
 0x2da   :  { %v1501_v5 = vadd.f32 %v1495_v42, %v1489_v45 }
 0x2db   :  { %v1517_v55 = vmul.f32 %v2671_v33, %v1500_v54  ;;  %1901 = vst [vmem:[%s2857_s11 + $0x10] sm:$0xff] %v1500_v54 }
 0x2dc   :  { %v1518_v36 = vmul.f32 %v2671_v33, %v1501_v5  ;;  %1902 = vst [vmem:[%s2857_s11 + $0x18] sm:$0xff] %v1501_v5 }
 0x2dd   :  { %v1533_v56 = vrot.slane %v1517_v55, 4 }
 0x2de   :  { %v1539_v6 = vrot.slane %v1518_v36, 4 }
 0x2df   :  { %v1534_v57 = vadd.f32 %v1533_v56, %v1517_v55  ;;  %v1497_v55 = vmul.f32 0.8, %v2612_v38 }
 0x2e0   :  { %v1540_v58 = vadd.f32 %v1539_v6, %v1518_v36 }
 0x2e1   :  { %v1535_v7 = vrot.slane %v1534_v57, 2 }
 0x2e2   :  { %v1541_v59 = vrot.slane %v1540_v58, 2 }
 0x2e3   :  { %v1536_v60 = vadd.f32 %v1535_v7, %v1534_v57 }
 0x2e4   :  { %v1542_v61 = vadd.f32 %v1541_v59, %v1540_v58 }
 0x2e5   :  { %v1537_v62 = vrot.slane %v1536_v60, 1 }
 0x2e6   :  { %v1543_v63 = vrot.slane %v1542_v61, 1 }
 0x2e7   :  { %v1538_v1 = vadd.f32 %v1537_v62, %v1536_v60 }
 0x2e8   :  { %v1544_v2 = vadd.f32 %v1543_v63, %v1542_v61 }
 0x2e9   :  { %v1560_v12 = vmul.f32 %v2686_v0, %v1538_v1 }
 0x2ea   :  { %v1561_v4 = vmul.f32 %v2686_v0, %v1544_v2 }
 0x2eb   :  { %v1566_v10 = vsub.f32 %v1500_v54, %v1560_v12  ;;  %v1496_v54 = vmul.f32 0.8, %v2621_v8 }
 0x2ec   :  { %v1567_v11 = vsub.f32 %v1501_v5, %v1561_v4 }
 0x2ed   :  { %v1572_v13 = vmul.f32 %v2671_v33, %v1566_v10  ;;  %v1658_v14 = vmul.f32 %v1637_v3, %v1566_v10 }
 0x2ee   :  { %v1573_v15 = vmul.f32 %v2671_v33, %v1567_v11  ;;  %v1659_v16 = vmul.f32 %v1641_v9, %v1567_v11 }
 0x2ef   :  { %v1578_v17 = vmul.f32 %v1572_v13, %v1572_v13 }
 0x2f0   :  { %v1579_v18 = vmul.f32 %v1573_v15, %v1573_v15 }
 0x2f1   :  { %v1594_v19 = vrot.slane %v1578_v17, 4 }
 0x2f2   :  { %v1600_v20 = vrot.slane %v1579_v18, 4 }
 0x2f3   :  { %v1595_v22 = vadd.f32 %v1594_v19, %v1578_v17 }
 0x2f4   :  { %v1601_v25 = vadd.f32 %v1600_v20, %v1579_v18 }
 0x2f5   :  { %v1596_v27 = vrot.slane %v1595_v22, 2 }
 0x2f6   :  { %v1602_v31 = vrot.slane %v1601_v25, 2 }
 0x2f7   :  { %v1597_v32 = vadd.f32 %v1596_v27, %v1595_v22 }
 0x2f8   :  { %v1603_v35 = vadd.f32 %v1602_v31, %v1601_v25 }
 0x2f9   :  { %v1598_v21 = vrot.slane %v1597_v32, 1 }
 0x2fa   :  { %v1604_v39 = vrot.slane %v1603_v35, 1 }
 0x2fb   :  { %v1599_v40 = vadd.f32 %v1598_v21, %v1597_v32 }
 0x2fc   :  { %v1605_v43 = vadd.f32 %v1604_v39, %v1603_v35 }
 0x2fd   :  { %v1620_v44 = vmul.f32 %v1599_v40, %v2686_v0 }
 0x2fe   :  { %v1621_v46 = vmul.f32 %v1605_v43, %v2686_v0 }
 0x2ff   :  { %v1664_v47 = vadd.f32 1e-05, %v1620_v44 }
 0x300   :  { %v1665_v48 = vadd.f32 1e-05, %v1621_v46 }
 0x301   :  { %2445 = vrsqrt.f32 %v1664_v47 }
 0x302   :  { %2447 = vrsqrt.f32 %v1665_v48  ;;  %v1644_v48 = vsub.s32 4, %v2665_v30 }
 0x30b   :  { %v2446_v37 = vpop.eup %2445 }
 0x30c   :  { %v2448_v23 = vpop.eup %2447  ;;  %v1676_v50 = vmul.f32 %v2446_v37, %v1658_v14  ;;  %v1645_v37 = vrot.slane %v2774_v24, %v1644_v48 }
 0x30d   :  { %v1677_v26 = vmul.f32 %v2448_v23, %v1659_v16 }
 0x30e   :  { %v1714_v42 = vadd.f32 %v1693_v49, %v1676_v50  ;;  %v1648_v49 = vsub.s32 5, %v2665_v30  ;;  %v1701_v50 = vrot.slane %v2783_v29, %v1644_v48 }
 0x30f   :  { %v1715_v51 = vadd.f32 %v1697_v41, %v1677_v26 }
 0x310   :  { %v1649_v41 = vrot.slane %v2774_v24, %v1648_v49 }
 0x311   :  { %v2122_v52 = vpack.c.bf16 %v1715_v51, %v1714_v42  ;;  %v1705_v51 = vrot.slane %v2783_v29, %v1648_v49 }
 0x313   :  { %1879 = vst [vmem:[%s2855_s9 + $0x8] sm:$0xff] %v2122_v52 }
 0x314   :  { %v1473_v53 = vpop.f32.mrb[8].mxu1 }
 0x315   :  { %v1484_v45 = vmax.f32 %v1473_v53, 0.0  ;;  %v1475_v5 = vpop.f32.mrb[9].mxu1 }
 0x316   :  { %v1485_v28 = vmax.f32 %v1475_v5, 0.0  ;;  %v1477_v36 = vpop.f32.mrb[10].mxu1 }
 0x317   :  { %v1490_v34 = vmul.f32 0.2, %v1484_v45  ;;  %v1478_v56 = vpop.f32.mrb[11].mxu1 }
 0x318   :  { %v1491_v6 = vmul.f32 0.2, %v1485_v28 }
 0x319   :  { %v1502_v57 = vadd.f32 %v1496_v54, %v1490_v34 }
 0x31a   :  { %v1503_v58 = vadd.f32 %v1497_v55, %v1491_v6 }
 0x31b   :  { %v1519_v7 = vmul.f32 %v2671_v33, %v1502_v57  ;;  %1903 = vst [vmem:[%s2857_s11 + $0x20] sm:$0xff] %v1502_v57 }
 0x31c   :  { %v1520_v59 = vmul.f32 %v2671_v33, %v1503_v58  ;;  %1904 = vst [vmem:[%s2857_s11 + $0x28] sm:$0xff] %v1503_v58 }
 0x31d   :  { %v1545_v8 = vrot.slane %v1519_v7, 4 }
 0x31e   :  { %v1551_v38 = vrot.slane %v1520_v59, 4 }
 0x31f   :  { %v1546_v60 = vadd.f32 %v1545_v8, %v1519_v7 }
 0x320   :  { %v1552_v61 = vadd.f32 %v1551_v38, %v1520_v59 }
 0x321   :  { %v1547_v62 = vrot.slane %v1546_v60, 2 }
 0x322   :  { %v1553_v63 = vrot.slane %v1552_v61, 2 }
 0x323   :  { %v1548_v1 = vadd.f32 %v1547_v62, %v1546_v60 }
 0x324   :  { %v1554_v2 = vadd.f32 %v1553_v63, %v1552_v61 }
 0x325   :  { %v1549_v12 = vrot.slane %v1548_v1, 1 }
 0x326   :  { %v1555_v3 = vrot.slane %v1554_v2, 1 }
 0x327   :  { %v1550_v4 = vadd.f32 %v1549_v12, %v1548_v1 }
 0x328   :  { %v1556_v9 = vadd.f32 %v1555_v3, %v1554_v2 }
 0x329   :  { %v1562_v10 = vmul.f32 %v2686_v0, %v1550_v4 }
 0x32a   :  { %v1563_v11 = vmul.f32 %v2686_v0, %v1556_v9 }
 0x32b   :  { %v1568_v13 = vsub.f32 %v1502_v57, %v1562_v10 }
 0x32c   :  { %v1569_v14 = vsub.f32 %v1503_v58, %v1563_v11 }
 0x32d   :  { %v1574_v15 = vmul.f32 %v2671_v33, %v1568_v13  ;;  %v1660_v23 = vmul.f32 %v1645_v37, %v1568_v13 }
 0x32e   :  { %v1575_v16 = vmul.f32 %v2671_v33, %v1569_v14  ;;  %v1661_v42 = vmul.f32 %v1649_v41, %v1569_v14 }
 0x32f   :  { %v1580_v17 = vmul.f32 %v1574_v15, %v1574_v15 }
 0x330   :  { %v1581_v18 = vmul.f32 %v1575_v16, %v1575_v16 }
 0x331   :  { %v1606_v19 = vrot.slane %v1580_v17, 4 }
 0x332   :  { %v1612_v20 = vrot.slane %v1581_v18, 4 }
 0x333   :  { %v1607_v22 = vadd.f32 %v1606_v19, %v1580_v17 }
 0x334   :  { %v1613_v25 = vadd.f32 %v1612_v20, %v1581_v18 }
 0x335   :  { %v1608_v27 = vrot.slane %v1607_v22, 2 }
 0x336   :  { %v1614_v31 = vrot.slane %v1613_v25, 2 }
 0x337   :  { %v1609_v32 = vadd.f32 %v1608_v27, %v1607_v22 }
 0x338   :  { %v1615_v35 = vadd.f32 %v1614_v31, %v1613_v25 }
 0x339   :  { %v1610_v21 = vrot.slane %v1609_v32, 1 }
 0x33a   :  { %v1616_v39 = vrot.slane %v1615_v35, 1 }
 0x33b   :  { %v1611_v40 = vadd.f32 %v1610_v21, %v1609_v32 }
 0x33c   :  { %v1617_v43 = vadd.f32 %v1616_v39, %v1615_v35 }
 0x33d   :  { %v1622_v44 = vmul.f32 %v1611_v40, %v2686_v0 }
 0x33e   :  { %v1623_v46 = vmul.f32 %v1617_v43, %v2686_v0 }
 0x33f   :  { %v1666_v47 = vadd.f32 1e-05, %v1622_v44 }
 0x340   :  { %v1667_v33 = vadd.f32 1e-05, %v1623_v46 }
 0x341   :  { %2449 = vrsqrt.f32 %v1666_v47 }
 0x342   :  { %2451 = vrsqrt.f32 %v1667_v33 }
 0x34b   :  { %v2450_v26 = vpop.eup %2449 }
 0x34c   :  { %v2452_v0 = vpop.eup %2451  ;;  %v1678_v52 = vmul.f32 %v2450_v26, %v1660_v23 }
 0x34d   :  { %v1679_v53 = vmul.f32 %v2452_v0, %v1661_v42 }
 0x34e   :  { %v1716_v45 = vadd.f32 %v1701_v50, %v1678_v52 }
 0x34f   :  { %v1717_v54 = vadd.f32 %v1705_v51, %v1679_v53 }
 0x351   :  { %v2123_v5 = vpack.c.bf16 %v1717_v54, %v1716_v45 }
 0x353   :  { %1880 = vst [vmem:[%s2855_s9 + $0x10] sm:$0xff] %v2123_v5 }
 0x354   :  { %1921 = vsyncpa [#allocation5], 1 }
 0x355   :  { %1922 = vsyncpa [#allocation7], 1 }

</bundles_post_ra>
